<compile_context>
chip_gen: v7x
topology: tpu7x:2x2x1
jax: 0.10.0
libtpu: 0.0.40
codegen_flags: <defaults>
</compile_context>

<pallas_src>
import functools

import jax
import jax.numpy as jnp
from jax.experimental import pallas as pl
from jax.experimental.pallas import tpu as pltpu  # noqa: F401  (TPU backend)

OUT_PAD = 128  # lane-dense output slab width


def _full_spec(shape):
    nd = len(shape)
    return pl.BlockSpec(shape, lambda *_: (0,) * nd)


# ---------------------------------------------------------------------------
# Single fused kernel: GIN layers + JK-max + Set2Set + classification head
# ---------------------------------------------------------------------------
def _fused_kernel(x_ref, a_ref, s_ref, st_ref, w1s_ref, w2s_ref, pvec_ref,
                  w_qh_ref, w_r_ref, lstm_b_ref, fc1_w_ref, fc1_b_ref,
                  fc2_w_ref, fc2_b_ref, o_ref, *, num_layers, steps, E):
    f32 = jnp.float32
    bf16 = jnp.bfloat16

    # ---- GIN conv stack with running JumpingKnowledge max ----
    A = a_ref[...]                                  # (N, N) bf16 adjacency
    x = x_ref[...]                                  # (N, E) f32 (features zero-padded to E)
    jk = None
    for l in range(num_layers):
        pv = pvec_ref[l]                            # (5, E): [(1+eps), b1, b2, bn_scale, bn_shift]
        agg = jnp.dot(A, x.astype(bf16), preferred_element_type=f32)   # sum_j x_j
        z = agg + x * pv[0]                         # + (1+eps) * x_i  (VPU, free slot)
        h = jnp.maximum(jnp.dot(z, w1s_ref[l], preferred_element_type=f32) + pv[1], 0.0)
        h = jnp.maximum(jnp.dot(h, w2s_ref[l], preferred_element_type=f32) + pv[2], 0.0)
        x = h * pv[3] + pv[4]                       # eval BatchNorm1d (scale/shift)
        jk = x if jk is None else jnp.maximum(jk, x)
    x = jk                                          # (N, E)

    # ---- Set2Set pooling ----
    S = s_ref[...]                                  # (N, G) one-hot (f32)
    St = st_ref[...]                                # (G, N)
    G = St.shape[0]
    mask = S > 0                                    # hoisted out of the steps loop

    w_qh = w_qh_ref[...]                            # (E, 4E) = W_ih[q-half] + W_hh (q == h)
    w_r = w_r_ref[...]                              # (E, 4E) = W_ih[r-half]
    lstm_b = lstm_b_ref[...]                        # (1, 4E)

    h = jnp.zeros((G, E), f32)
    c = jnp.zeros((G, E), f32)
    r = jnp.zeros((G, E), f32)
    for _ in range(steps):
        # fused LSTM gates: one (G,128)-lane tile, PyTorch gate order i, f, g, o
        gates = (jnp.dot(h, w_qh, preferred_element_type=f32)
                 + jnp.dot(r, w_r, preferred_element_type=f32) + lstm_b)
        i_g = jax.nn.sigmoid(gates[:, 0 * E:1 * E])
        f_g = jax.nn.sigmoid(gates[:, 1 * E:2 * E])
        g_g = jnp.tanh(gates[:, 2 * E:3 * E])
        o_g = jax.nn.sigmoid(gates[:, 3 * E:4 * E])
        c = f_g * c + i_g * g_g
        h = o_g * jnp.tanh(c)
        q = h                                       # (G, E)

        # attention: logits[n, g] = x_n . q_g, masked per-graph softmax on (N, G)
        logits = jax.lax.dot_general(x, q, (((1,), (1,)), ((), ())),
                                     preferred_element_type=f32)      # (N, G)
        neg = jnp.where(mask, logits, -1e30)
        maxes = jnp.max(neg, axis=0, keepdims=True)                   # (1, G)
        p = jnp.where(mask, jnp.exp(logits - maxes), 0.0)             # (N, G), masked lanes exact 0
        den = jnp.sum(p, axis=0, keepdims=True)                       # (1, G)
        a = p * pl.reciprocal(den, approx=True)                       # (N, G)
        a_node = jnp.sum(a, axis=1, keepdims=True)                    # (N, 1) (one nonzero lane/row)
        r = jnp.dot(St, a_node * x, preferred_element_type=f32)       # (G, E) readout

    # ---- head: ReLU([q, r] @ W1 + b1) @ W2_pad + b2_pad (no concat: split W1) ----
    w_fc1 = fc1_w_ref[...]                          # (2E, E)
    hd = (jnp.dot(h, w_fc1[:E], preferred_element_type=f32)
          + jnp.dot(r, w_fc1[E:], preferred_element_type=f32) + fc1_b_ref[...])
    hd = jnp.maximum(hd, 0.0)
    o_ref[...] = jnp.dot(hd, fc2_w_ref[...], preferred_element_type=f32) + fc2_b_ref[...]


# ---------------------------------------------------------------------------
# Wrapper: parameter packing + single pallas_call
# ---------------------------------------------------------------------------
def net_forward(params, x, A, S, St, num_layers, process_step):
    f32 = jnp.float32
    N, F = x.shape
    E = params["convs"][0]["w1"].shape[1]
    G = St.shape[0]
    C = params["fc2_w"].shape[1]

    # pad node features to E lanes so every layer shares the same (E,E) weight slab
    x_pad = jnp.zeros((N, E), f32).at[:, :F].set(x)
    # one bf16 adjacency shared by all layers (0/1 entries are exact in bf16)
    A_bf16 = A.astype(jnp.bfloat16)

    # per-layer slabs: w1s/w2s (L,E,E), param-vector slab (L,5,E)
    w1_list, w2_list, pv_list = [], [], []
    for p in params["convs"]:
        w1 = p["w1"]
        if w1.shape[0] < E:                         # layer 0: zero-pad F -> E rows
            w1 = jnp.zeros((E, E), f32).at[:w1.shape[0], :].set(w1)
        w1_list.append(w1)
        w2_list.append(p["w2"])
        one_eps = jnp.full((1, E), 1.0, f32) + p["eps"][0, 0]
        pv_list.append(jnp.concatenate(
            [one_eps, p["b1"], p["b2"], p["bn_scale"], p["bn_shift"]], axis=0))
    w1s = jnp.stack(w1_list, 0)                     # (L, E, E)
    w2s = jnp.stack(w2_list, 0)                     # (L, E, E)
    pvecs = jnp.stack(pv_list, 0)                   # (L, 5, E)

    # LSTM: single-layer cell => output q equals hidden h, so fold the q-half of
    # W_ih into W_hh (2 full-width (E,4E) dots per Set2Set step instead of 8).
    w_ih_t = params["s2s"]["w_ih_t"]                # (2E, 4E)
    w_hh_t = params["s2s"]["w_hh_t"]                # (E, 4E)
    w_qh = w_ih_t[:E] + w_hh_t                      # (E, 4E)
    w_r = w_ih_t[E:]                                # (E, 4E)
    lstm_b = params["s2s"]["bias"]                  # (1, 4E)  (= b_ih + b_hh)

    # lane-dense output: pad fc2 to OUT_PAD output lanes, slice after the call
    fc2_w_pad = jnp.zeros((E, OUT_PAD), f32).at[:, :C].set(params["fc2_w"])
    fc2_b_pad = jnp.zeros((1, OUT_PAD), f32).at[:, :C].set(params["fc2_b"])

    args = [x_pad, A_bf16, S, St, w1s, w2s, pvecs, w_qh, w_r, lstm_b,
            params["fc1_w"], params["fc1_b"], fc2_w_pad, fc2_b_pad]

    kernel = functools.partial(_fused_kernel, num_layers=num_layers,
                               steps=process_step, E=E)
    out = pl.pallas_call(
        kernel,
        out_shape=jax.ShapeDtypeStruct((G, OUT_PAD), f32),
        in_specs=[_full_spec(a.shape) for a in args],
        out_specs=_full_spec((G, OUT_PAD)),
    )(*args)
    return out[:, :C]


# ---------------------------------------------------------------------------
# Pure-JAX reference (for a loose sanity check)
# ---------------------------------------------------------------------------
def ref_forward(params, x, A, S, St, num_layers, steps):
    E = params["convs"][0]["w1"].shape[1]
    G = St.shape[0]
    xs = []
    for p in params["convs"]:
        z = (1.0 + p["eps"][0, 0]) * x + A @ x
        h = jnp.maximum(z @ p["w1"] + p["b1"], 0.0)
        h = jnp.maximum(h @ p["w2"] + p["b2"], 0.0)
        x = h * p["bn_scale"] + p["bn_shift"]
        xs.append(x)
    x = jnp.max(jnp.stack(xs, 0), axis=0)
    w_ih_t, w_hh_t, bias = (params["s2s"]["w_ih_t"], params["s2s"]["w_hh_t"],
                            params["s2s"]["bias"])
    h = jnp.zeros((G, E)); c = jnp.zeros((G, E)); q_star = jnp.zeros((G, 2 * E))
    for _ in range(steps):
        gates = q_star @ w_ih_t + h @ w_hh_t + bias
        i = jax.nn.sigmoid(gates[:, 0 * E:1 * E])
        f = jax.nn.sigmoid(gates[:, 1 * E:2 * E])
        g = jnp.tanh(gates[:, 2 * E:3 * E])
        o = jax.nn.sigmoid(gates[:, 3 * E:4 * E])
        c = f * c + i * g
        h = o * jnp.tanh(c)
        q = h
        e = jnp.sum(x * (S @ q), axis=1, keepdims=True)
        masked = jnp.where(S > 0, e, -1e30)
        maxes = jnp.max(masked, axis=0, keepdims=True)
        num = jnp.exp(e - jnp.sum(S * maxes, axis=1, keepdims=True))
        den = St @ num
        a = num / (S @ den)
        r = St @ (a * x)
        q_star = jnp.concatenate([q, r], axis=1)
    hd = jnp.maximum(q_star @ params["fc1_w"] + params["fc1_b"], 0.0)
    return hd @ params["fc2_w"] + params["fc2_b"]


if __name__ == "__main__":
    # Hyperparameters (small, consistent with the module)
    num_classes = 3
    num_layers = 3
    feat_dim = 8
    embed_dim = 32
    jk_layer = "max"
    process_step = 3
    # dropout = 0.5  # identity in eval mode

    N = 16   # total nodes
    G = 2    # graphs in the batch (8 nodes each)

    key = jax.random.PRNGKey(0)

    def nrm(k, shape, scale=0.1):
        return scale * jax.random.normal(k, shape, dtype=jnp.float32)

    keys = jax.random.split(key, 32)
    ki = iter(keys)

    # ---- inputs: node features, edge_index, batch assignment ----
    x = nrm(next(ki), (N, feat_dim), scale=1.0)
    src, dst = [], []
    for g in range(G):                       # bidirectional ring inside each graph
        base = g * 8
        for i in range(8):
            a, b = base + i, base + (i + 1) % 8
            src += [a, b]
            dst += [b, a]
    edge_index = jnp.array([src, dst], dtype=jnp.int32)          # (2, 32)
    batch = jnp.array([n // 8 for n in range(N)], dtype=jnp.int32)

    A = jnp.zeros((N, N), jnp.float32).at[edge_index[1], edge_index[0]].set(1.0)
    S = jax.nn.one_hot(batch, G, dtype=jnp.float32)               # (N, G)
    St = S.T                                                      # (G, N)

    # ---- parameters (deterministic synthetic init) ----
    bn_eps = 1e-5
    convs = []
    for i in range(num_layers):
        in_dim = feat_dim if i == 0 else embed_dim
        gamma = jnp.ones((1, embed_dim), jnp.float32)
        beta = jnp.zeros((1, embed_dim), jnp.float32)
        run_mean = jnp.zeros((1, embed_dim), jnp.float32)
        run_var = jnp.ones((1, embed_dim), jnp.float32)
        bn_scale = gamma / jnp.sqrt(run_var + bn_eps)
        bn_shift = beta - run_mean * bn_scale
        convs.append(dict(
            eps=jnp.zeros((1, 1), jnp.float32),            # train_eps init 0.0
            w1=nrm(next(ki), (in_dim, embed_dim)),
            b1=nrm(next(ki), (1, embed_dim)),
            w2=nrm(next(ki), (embed_dim, embed_dim)),
            b2=nrm(next(ki), (1, embed_dim)),
            bn_scale=bn_scale,
            bn_shift=bn_shift,
        ))

    s2s = dict(
        # LSTM(2*E -> E): transposed weights, combined bias (b_ih + b_hh)
        w_ih_t=nrm(next(ki), (2 * embed_dim, 4 * embed_dim)),
        w_hh_t=nrm(next(ki), (embed_dim, 4 * embed_dim)),
        bias=nrm(next(ki), (1, 4 * embed_dim)),
    )

    params = dict(
        convs=convs,
        s2s=s2s,
        fc1_w=nrm(next(ki), (2 * embed_dim, embed_dim)),
        fc1_b=nrm(next(ki), (1, embed_dim)),
        fc2_w=nrm(next(ki), (embed_dim, num_classes)),
        fc2_b=nrm(next(ki), (1, num_classes)),
    )

    fwd = jax.jit(net_forward, static_argnames=("num_layers", "process_step"))
    logits = fwd(params, x, A, S, St, num_layers=num_layers,
                 process_step=process_step)
    jax.block_until_ready(logits)
    assert logits.shape == (G, num_classes)

    # loose sanity check against a pure-JAX reference
    # (MXU vs XLA precision + bf16 aggregation operands)
    ref = ref_forward(params, x, A, S, St, num_layers, process_step)
    assert jnp.max(jnp.abs(logits - ref)) < 1e-1

    print("KERNEL_OK")
</pallas_src>

<mosaic_0001>
module attributes {stable_mosaic.version = 11 : i64} {
  func.func @_fused_kernel(%arg0: memref<16x32xf32, #tpu.memory_space<vmem>>, %arg1: memref<16x16xbf16, #tpu.memory_space<vmem>>, %arg2: memref<16x2xf32, #tpu.memory_space<vmem>>, %arg3: memref<2x16xf32, #tpu.memory_space<vmem>>, %arg4: memref<3x32x32xf32, #tpu.memory_space<vmem>>, %arg5: memref<3x32x32xf32, #tpu.memory_space<vmem>>, %arg6: memref<3x5x32xf32, #tpu.memory_space<vmem>>, %arg7: memref<32x128xf32, #tpu.memory_space<vmem>>, %arg8: memref<32x128xf32, #tpu.memory_space<vmem>>, %arg9: memref<1x128xf32, #tpu.memory_space<vmem>>, %arg10: memref<64x32xf32, #tpu.memory_space<vmem>>, %arg11: memref<1x32xf32, #tpu.memory_space<vmem>>, %arg12: memref<32x128xf32, #tpu.memory_space<vmem>>, %arg13: memref<1x128xf32, #tpu.memory_space<vmem>>, %arg14: memref<2x128xf32, #tpu.memory_space<vmem>>) attributes {dimension_semantics = [], scalar_prefetch = 0 : i64, scratch_operands = 0 : i64, tpu.core_type = #tpu.core_type<tc>} {
    %c0 = arith.constant 0 : index
    %c0_0 = arith.constant 0 : index
    %0 = vector.load %arg1[%c0, %c0_0] : memref<16x16xbf16, #tpu.memory_space<vmem>>, vector<16x16xbf16>
    %c0_1 = arith.constant 0 : index
    %c0_2 = arith.constant 0 : index
    %1 = vector.load %arg0[%c0_1, %c0_2] : memref<16x32xf32, #tpu.memory_space<vmem>>, vector<16x32xf32>
    %c0_3 = arith.constant 0 : index
    %c0_4 = arith.constant 0 : index
    %c0_5 = arith.constant 0 : index
    %2 = vector.load %arg6[%c0_3, %c0_4, %c0_5] : memref<3x5x32xf32, #tpu.memory_space<vmem>>, vector<1x5x32xf32>
    %3 = vector.shape_cast %2 : vector<1x5x32xf32> to vector<5x32xf32>
    %4 = arith.truncf %1 : vector<16x32xf32> to vector<16x32xbf16>
    %cst = arith.constant dense<0.000000e+00> : vector<16x32xf32>
    %5 = tpu.matmul %0, %4, %cst {dimension_numbers = #tpu.dot_dimension_numbers<[1], [0], [0], [1], [0, 0, 1, 1], [], []>} : vector<16x16xbf16>, vector<16x32xbf16>, vector<16x32xf32> -> vector<16x32xf32>
    %6 = vector.extract_strided_slice %3 {offsets = [0, 0], sizes = [1, 32], strides = [1, 1]} : vector<5x32xf32> to vector<1x32xf32>
    %7 = vector.shape_cast %6 : vector<1x32xf32> to vector<32xf32>
    %8 = vector.shape_cast %7 : vector<32xf32> to vector<1x32xf32>
    %9 = vector.broadcast %8 : vector<1x32xf32> to vector<16x32xf32>
    %10 = arith.mulf %1, %9 : vector<16x32xf32>
    %11 = arith.addf %5, %10 : vector<16x32xf32>
    %c0_6 = arith.constant 0 : index
    %c0_7 = arith.constant 0 : index
    %c0_8 = arith.constant 0 : index
    %12 = vector.load %arg4[%c0_6, %c0_7, %c0_8] : memref<3x32x32xf32, #tpu.memory_space<vmem>>, vector<1x32x32xf32>
    %13 = vector.shape_cast %12 : vector<1x32x32xf32> to vector<32x32xf32>
    %cst_9 = arith.constant dense<0.000000e+00> : vector<16x32xf32>
    %14 = tpu.matmul %11, %13, %cst_9 {dimension_numbers = #tpu.dot_dimension_numbers<[1], [0], [0], [1], [0, 0, 1, 1], [], []>} : vector<16x32xf32>, vector<32x32xf32>, vector<16x32xf32> -> vector<16x32xf32>
    %15 = vector.extract_strided_slice %3 {offsets = [1, 0], sizes = [1, 32], strides = [1, 1]} : vector<5x32xf32> to vector<1x32xf32>
    %16 = vector.shape_cast %15 : vector<1x32xf32> to vector<32xf32>
    %17 = vector.shape_cast %16 : vector<32xf32> to vector<1x32xf32>
    %18 = vector.broadcast %17 : vector<1x32xf32> to vector<16x32xf32>
    %19 = arith.addf %14, %18 : vector<16x32xf32>
    %cst_10 = arith.constant 0.000000e+00 : f32
    %20 = vector.broadcast %cst_10 : f32 to vector<16x32xf32>
    %21 = arith.maximumf %19, %20 : vector<16x32xf32>
    %c0_11 = arith.constant 0 : index
    %c0_12 = arith.constant 0 : index
    %c0_13 = arith.constant 0 : index
    %22 = vector.load %arg5[%c0_11, %c0_12, %c0_13] : memref<3x32x32xf32, #tpu.memory_space<vmem>>, vector<1x32x32xf32>
    %23 = vector.shape_cast %22 : vector<1x32x32xf32> to vector<32x32xf32>
    %cst_14 = arith.constant dense<0.000000e+00> : vector<16x32xf32>
    %24 = tpu.matmul %21, %23, %cst_14 {dimension_numbers = #tpu.dot_dimension_numbers<[1], [0], [0], [1], [0, 0, 1, 1], [], []>} : vector<16x32xf32>, vector<32x32xf32>, vector<16x32xf32> -> vector<16x32xf32>
    %25 = vector.extract_strided_slice %3 {offsets = [2, 0], sizes = [1, 32], strides = [1, 1]} : vector<5x32xf32> to vector<1x32xf32>
    %26 = vector.shape_cast %25 : vector<1x32xf32> to vector<32xf32>
    %27 = vector.shape_cast %26 : vector<32xf32> to vector<1x32xf32>
    %28 = vector.broadcast %27 : vector<1x32xf32> to vector<16x32xf32>
    %29 = arith.addf %24, %28 : vector<16x32xf32>
    %cst_15 = arith.constant 0.000000e+00 : f32
    %30 = vector.broadcast %cst_15 : f32 to vector<16x32xf32>
    %31 = arith.maximumf %29, %30 : vector<16x32xf32>
    %32 = vector.extract_strided_slice %3 {offsets = [3, 0], sizes = [1, 32], strides = [1, 1]} : vector<5x32xf32> to vector<1x32xf32>
    %33 = vector.shape_cast %32 : vector<1x32xf32> to vector<32xf32>
    %34 = vector.shape_cast %33 : vector<32xf32> to vector<1x32xf32>
    %35 = vector.broadcast %34 : vector<1x32xf32> to vector<16x32xf32>
    %36 = arith.mulf %31, %35 : vector<16x32xf32>
    %37 = vector.extract_strided_slice %3 {offsets = [4, 0], sizes = [1, 32], strides = [1, 1]} : vector<5x32xf32> to vector<1x32xf32>
    %38 = vector.shape_cast %37 : vector<1x32xf32> to vector<32xf32>
    %39 = vector.shape_cast %38 : vector<32xf32> to vector<1x32xf32>
    %40 = vector.broadcast %39 : vector<1x32xf32> to vector<16x32xf32>
    %41 = arith.addf %36, %40 : vector<16x32xf32>
    %c1 = arith.constant 1 : index
    %c0_16 = arith.constant 0 : index
    %c0_17 = arith.constant 0 : index
    %42 = vector.load %arg6[%c1, %c0_16, %c0_17] : memref<3x5x32xf32, #tpu.memory_space<vmem>>, vector<1x5x32xf32>
    %43 = vector.shape_cast %42 : vector<1x5x32xf32> to vector<5x32xf32>
    %44 = arith.truncf %41 : vector<16x32xf32> to vector<16x32xbf16>
    %cst_18 = arith.constant dense<0.000000e+00> : vector<16x32xf32>
    %45 = tpu.matmul %0, %44, %cst_18 {dimension_numbers = #tpu.dot_dimension_numbers<[1], [0], [0], [1], [0, 0, 1, 1], [], []>} : vector<16x16xbf16>, vector<16x32xbf16>, vector<16x32xf32> -> vector<16x32xf32>
    %46 = vector.extract_strided_slice %43 {offsets = [0, 0], sizes = [1, 32], strides = [1, 1]} : vector<5x32xf32> to vector<1x32xf32>
    %47 = vector.shape_cast %46 : vector<1x32xf32> to vector<32xf32>
    %48 = vector.shape_cast %47 : vector<32xf32> to vector<1x32xf32>
    %49 = vector.broadcast %48 : vector<1x32xf32> to vector<16x32xf32>
    %50 = arith.mulf %41, %49 : vector<16x32xf32>
    %51 = arith.addf %45, %50 : vector<16x32xf32>
    %c1_19 = arith.constant 1 : index
    %c0_20 = arith.constant 0 : index
    %c0_21 = arith.constant 0 : index
    %52 = vector.load %arg4[%c1_19, %c0_20, %c0_21] : memref<3x32x32xf32, #tpu.memory_space<vmem>>, vector<1x32x32xf32>
    %53 = vector.shape_cast %52 : vector<1x32x32xf32> to vector<32x32xf32>
    %cst_22 = arith.constant dense<0.000000e+00> : vector<16x32xf32>
    %54 = tpu.matmul %51, %53, %cst_22 {dimension_numbers = #tpu.dot_dimension_numbers<[1], [0], [0], [1], [0, 0, 1, 1], [], []>} : vector<16x32xf32>, vector<32x32xf32>, vector<16x32xf32> -> vector<16x32xf32>
    %55 = vector.extract_strided_slice %43 {offsets = [1, 0], sizes = [1, 32], strides = [1, 1]} : vector<5x32xf32> to vector<1x32xf32>
    %56 = vector.shape_cast %55 : vector<1x32xf32> to vector<32xf32>
    %57 = vector.shape_cast %56 : vector<32xf32> to vector<1x32xf32>
    %58 = vector.broadcast %57 : vector<1x32xf32> to vector<16x32xf32>
    %59 = arith.addf %54, %58 : vector<16x32xf32>
    %cst_23 = arith.constant 0.000000e+00 : f32
    %60 = vector.broadcast %cst_23 : f32 to vector<16x32xf32>
    %61 = arith.maximumf %59, %60 : vector<16x32xf32>
    %c1_24 = arith.constant 1 : index
    %c0_25 = arith.constant 0 : index
    %c0_26 = arith.constant 0 : index
    %62 = vector.load %arg5[%c1_24, %c0_25, %c0_26] : memref<3x32x32xf32, #tpu.memory_space<vmem>>, vector<1x32x32xf32>
    %63 = vector.shape_cast %62 : vector<1x32x32xf32> to vector<32x32xf32>
    %cst_27 = arith.constant dense<0.000000e+00> : vector<16x32xf32>
    %64 = tpu.matmul %61, %63, %cst_27 {dimension_numbers = #tpu.dot_dimension_numbers<[1], [0], [0], [1], [0, 0, 1, 1], [], []>} : vector<16x32xf32>, vector<32x32xf32>, vector<16x32xf32> -> vector<16x32xf32>
    %65 = vector.extract_strided_slice %43 {offsets = [2, 0], sizes = [1, 32], strides = [1, 1]} : vector<5x32xf32> to vector<1x32xf32>
    %66 = vector.shape_cast %65 : vector<1x32xf32> to vector<32xf32>
    %67 = vector.shape_cast %66 : vector<32xf32> to vector<1x32xf32>
    %68 = vector.broadcast %67 : vector<1x32xf32> to vector<16x32xf32>
    %69 = arith.addf %64, %68 : vector<16x32xf32>
    %cst_28 = arith.constant 0.000000e+00 : f32
    %70 = vector.broadcast %cst_28 : f32 to vector<16x32xf32>
    %71 = arith.maximumf %69, %70 : vector<16x32xf32>
    %72 = vector.extract_strided_slice %43 {offsets = [3, 0], sizes = [1, 32], strides = [1, 1]} : vector<5x32xf32> to vector<1x32xf32>
    %73 = vector.shape_cast %72 : vector<1x32xf32> to vector<32xf32>
    %74 = vector.shape_cast %73 : vector<32xf32> to vector<1x32xf32>
    %75 = vector.broadcast %74 : vector<1x32xf32> to vector<16x32xf32>
    %76 = arith.mulf %71, %75 : vector<16x32xf32>
    %77 = vector.extract_strided_slice %43 {offsets = [4, 0], sizes = [1, 32], strides = [1, 1]} : vector<5x32xf32> to vector<1x32xf32>
    %78 = vector.shape_cast %77 : vector<1x32xf32> to vector<32xf32>
    %79 = vector.shape_cast %78 : vector<32xf32> to vector<1x32xf32>
    %80 = vector.broadcast %79 : vector<1x32xf32> to vector<16x32xf32>
    %81 = arith.addf %76, %80 : vector<16x32xf32>
    %82 = arith.maximumf %41, %81 : vector<16x32xf32>
    %c2 = arith.constant 2 : index
    %c0_29 = arith.constant 0 : index
    %c0_30 = arith.constant 0 : index
    %83 = vector.load %arg6[%c2, %c0_29, %c0_30] : memref<3x5x32xf32, #tpu.memory_space<vmem>>, vector<1x5x32xf32>
    %84 = vector.shape_cast %83 : vector<1x5x32xf32> to vector<5x32xf32>
    %85 = arith.truncf %81 : vector<16x32xf32> to vector<16x32xbf16>
    %cst_31 = arith.constant dense<0.000000e+00> : vector<16x32xf32>
    %86 = tpu.matmul %0, %85, %cst_31 {dimension_numbers = #tpu.dot_dimension_numbers<[1], [0], [0], [1], [0, 0, 1, 1], [], []>} : vector<16x16xbf16>, vector<16x32xbf16>, vector<16x32xf32> -> vector<16x32xf32>
    %87 = vector.extract_strided_slice %84 {offsets = [0, 0], sizes = [1, 32], strides = [1, 1]} : vector<5x32xf32> to vector<1x32xf32>
    %88 = vector.shape_cast %87 : vector<1x32xf32> to vector<32xf32>
    %89 = vector.shape_cast %88 : vector<32xf32> to vector<1x32xf32>
    %90 = vector.broadcast %89 : vector<1x32xf32> to vector<16x32xf32>
    %91 = arith.mulf %81, %90 : vector<16x32xf32>
    %92 = arith.addf %86, %91 : vector<16x32xf32>
    %c2_32 = arith.constant 2 : index
    %c0_33 = arith.constant 0 : index
    %c0_34 = arith.constant 0 : index
    %93 = vector.load %arg4[%c2_32, %c0_33, %c0_34] : memref<3x32x32xf32, #tpu.memory_space<vmem>>, vector<1x32x32xf32>
    %94 = vector.shape_cast %93 : vector<1x32x32xf32> to vector<32x32xf32>
    %cst_35 = arith.constant dense<0.000000e+00> : vector<16x32xf32>
    %95 = tpu.matmul %92, %94, %cst_35 {dimension_numbers = #tpu.dot_dimension_numbers<[1], [0], [0], [1], [0, 0, 1, 1], [], []>} : vector<16x32xf32>, vector<32x32xf32>, vector<16x32xf32> -> vector<16x32xf32>
    %96 = vector.extract_strided_slice %84 {offsets = [1, 0], sizes = [1, 32], strides = [1, 1]} : vector<5x32xf32> to vector<1x32xf32>
    %97 = vector.shape_cast %96 : vector<1x32xf32> to vector<32xf32>
    %98 = vector.shape_cast %97 : vector<32xf32> to vector<1x32xf32>
    %99 = vector.broadcast %98 : vector<1x32xf32> to vector<16x32xf32>
    %100 = arith.addf %95, %99 : vector<16x32xf32>
    %cst_36 = arith.constant 0.000000e+00 : f32
    %101 = vector.broadcast %cst_36 : f32 to vector<16x32xf32>
    %102 = arith.maximumf %100, %101 : vector<16x32xf32>
    %c2_37 = arith.constant 2 : index
    %c0_38 = arith.constant 0 : index
    %c0_39 = arith.constant 0 : index
    %103 = vector.load %arg5[%c2_37, %c0_38, %c0_39] : memref<3x32x32xf32, #tpu.memory_space<vmem>>, vector<1x32x32xf32>
    %104 = vector.shape_cast %103 : vector<1x32x32xf32> to vector<32x32xf32>
    %cst_40 = arith.constant dense<0.000000e+00> : vector<16x32xf32>
    %105 = tpu.matmul %102, %104, %cst_40 {dimension_numbers = #tpu.dot_dimension_numbers<[1], [0], [0], [1], [0, 0, 1, 1], [], []>} : vector<16x32xf32>, vector<32x32xf32>, vector<16x32xf32> -> vector<16x32xf32>
    %106 = vector.extract_strided_slice %84 {offsets = [2, 0], sizes = [1, 32], strides = [1, 1]} : vector<5x32xf32> to vector<1x32xf32>
    %107 = vector.shape_cast %106 : vector<1x32xf32> to vector<32xf32>
    %108 = vector.shape_cast %107 : vector<32xf32> to vector<1x32xf32>
    %109 = vector.broadcast %108 : vector<1x32xf32> to vector<16x32xf32>
    %110 = arith.addf %105, %109 : vector<16x32xf32>
    %cst_41 = arith.constant 0.000000e+00 : f32
    %111 = vector.broadcast %cst_41 : f32 to vector<16x32xf32>
    %112 = arith.maximumf %110, %111 : vector<16x32xf32>
    %113 = vector.extract_strided_slice %84 {offsets = [3, 0], sizes = [1, 32], strides = [1, 1]} : vector<5x32xf32> to vector<1x32xf32>
    %114 = vector.shape_cast %113 : vector<1x32xf32> to vector<32xf32>
    %115 = vector.shape_cast %114 : vector<32xf32> to vector<1x32xf32>
    %116 = vector.broadcast %115 : vector<1x32xf32> to vector<16x32xf32>
    %117 = arith.mulf %112, %116 : vector<16x32xf32>
    %118 = vector.extract_strided_slice %84 {offsets = [4, 0], sizes = [1, 32], strides = [1, 1]} : vector<5x32xf32> to vector<1x32xf32>
    %119 = vector.shape_cast %118 : vector<1x32xf32> to vector<32xf32>
    %120 = vector.shape_cast %119 : vector<32xf32> to vector<1x32xf32>
    %121 = vector.broadcast %120 : vector<1x32xf32> to vector<16x32xf32>
    %122 = arith.addf %117, %121 : vector<16x32xf32>
    %123 = arith.maximumf %82, %122 : vector<16x32xf32>
    %c0_42 = arith.constant 0 : index
    %c0_43 = arith.constant 0 : index
    %124 = vector.load %arg2[%c0_42, %c0_43] : memref<16x2xf32, #tpu.memory_space<vmem>>, vector<16x2xf32>
    %c0_44 = arith.constant 0 : index
    %c0_45 = arith.constant 0 : index
    %125 = vector.load %arg3[%c0_44, %c0_45] : memref<2x16xf32, #tpu.memory_space<vmem>>, vector<2x16xf32>
    %cst_46 = arith.constant 0.000000e+00 : f32
    %126 = vector.broadcast %cst_46 : f32 to vector<16x2xf32>
    %127 = arith.cmpf ogt, %124, %126 : vector<16x2xf32>
    %c0_47 = arith.constant 0 : index
    %c0_48 = arith.constant 0 : index
    %128 = vector.load %arg7[%c0_47, %c0_48] : memref<32x128xf32, #tpu.memory_space<vmem>>, vector<32x128xf32>
    %c0_49 = arith.constant 0 : index
    %c0_50 = arith.constant 0 : index
    %129 = vector.load %arg8[%c0_49, %c0_50] : memref<32x128xf32, #tpu.memory_space<vmem>>, vector<32x128xf32>
    %c0_51 = arith.constant 0 : index
    %c0_52 = arith.constant 0 : index
    %130 = vector.load %arg9[%c0_51, %c0_52] : memref<1x128xf32, #tpu.memory_space<vmem>>, vector<1x128xf32>
    %cst_53 = arith.constant 0.000000e+00 : f32
    %131 = vector.broadcast %cst_53 : f32 to vector<2x32xf32>
    %cst_54 = arith.constant 0.000000e+00 : f32
    %132 = vector.broadcast %cst_54 : f32 to vector<2x32xf32>
    %cst_55 = arith.constant 0.000000e+00 : f32
    %133 = vector.broadcast %cst_55 : f32 to vector<2x32xf32>
    %cst_56 = arith.constant dense<0.000000e+00> : vector<2x128xf32>
    %134 = tpu.matmul %131, %128, %cst_56 {dimension_numbers = #tpu.dot_dimension_numbers<[1], [0], [0], [1], [0, 0, 1, 1], [], []>} : vector<2x32xf32>, vector<32x128xf32>, vector<2x128xf32> -> vector<2x128xf32>
    %cst_57 = arith.constant dense<0.000000e+00> : vector<2x128xf32>
    %135 = tpu.matmul %133, %129, %cst_57 {dimension_numbers = #tpu.dot_dimension_numbers<[1], [0], [0], [1], [0, 0, 1, 1], [], []>} : vector<2x32xf32>, vector<32x128xf32>, vector<2x128xf32> -> vector<2x128xf32>
    %136 = arith.addf %134, %135 : vector<2x128xf32>
    %137 = vector.broadcast %130 : vector<1x128xf32> to vector<2x128xf32>
    %138 = arith.addf %136, %137 : vector<2x128xf32>
    %139 = vector.extract_strided_slice %138 {offsets = [0, 0], sizes = [2, 32], strides = [1, 1]} : vector<2x128xf32> to vector<2x32xf32>
    %140 = arith.negf %139 : vector<2x32xf32>
    %141 = math.exp %140 : vector<2x32xf32>
    %cst_58 = arith.constant 1.000000e+00 : f32
    %142 = vector.broadcast %cst_58 : f32 to vector<2x32xf32>
    %143 = arith.addf %142, %141 : vector<2x32xf32>
    %144 = arith.divf %142, %143 : vector<2x32xf32>
    %145 = vector.extract_strided_slice %138 {offsets = [0, 32], sizes = [2, 32], strides = [1, 1]} : vector<2x128xf32> to vector<2x32xf32>
    %146 = arith.negf %145 : vector<2x32xf32>
    %147 = math.exp %146 : vector<2x32xf32>
    %cst_59 = arith.constant 1.000000e+00 : f32
    %148 = vector.broadcast %cst_59 : f32 to vector<2x32xf32>
    %149 = arith.addf %148, %147 : vector<2x32xf32>
    %150 = arith.divf %148, %149 : vector<2x32xf32>
    %151 = vector.extract_strided_slice %138 {offsets = [0, 64], sizes = [2, 32], strides = [1, 1]} : vector<2x128xf32> to vector<2x32xf32>
    %152 = math.tanh %151 : vector<2x32xf32>
    %153 = vector.extract_strided_slice %138 {offsets = [0, 96], sizes = [2, 32], strides = [1, 1]} : vector<2x128xf32> to vector<2x32xf32>
    %154 = arith.negf %153 : vector<2x32xf32>
    %155 = math.exp %154 : vector<2x32xf32>
    %cst_60 = arith.constant 1.000000e+00 : f32
    %156 = vector.broadcast %cst_60 : f32 to vector<2x32xf32>
    %157 = arith.addf %156, %155 : vector<2x32xf32>
    %158 = arith.divf %156, %157 : vector<2x32xf32>
    %159 = arith.mulf %150, %132 : vector<2x32xf32>
    %160 = arith.mulf %144, %152 : vector<2x32xf32>
    %161 = arith.addf %159, %160 : vector<2x32xf32>
    %162 = math.tanh %161 : vector<2x32xf32>
    %163 = arith.mulf %158, %162 : vector<2x32xf32>
    %cst_61 = arith.constant dense<0.000000e+00> : vector<16x2xf32>
    %164 = tpu.matmul %123, %163, %cst_61 {dimension_numbers = #tpu.dot_dimension_numbers<[1], [1], [0], [0], [0, 0, 1, 0], [], []>} : vector<16x32xf32>, vector<2x32xf32>, vector<16x2xf32> -> vector<16x2xf32>
    %cst_62 = arith.constant -1.000000e+30 : f32
    %165 = vector.broadcast %cst_62 : f32 to vector<16x2xf32>
    %166 = arith.select %127, %164, %165 : vector<16x2xi1>, vector<16x2xf32>
    %cst_63 = arith.constant dense<0xFF800000> : vector<2xf32>
    %167 = vector.multi_reduction <maximumf>, %166, %cst_63 [0] : vector<16x2xf32> to vector<2xf32>
    %168 = vector.shape_cast %167 : vector<2xf32> to vector<1x2xf32>
    %169 = vector.broadcast %168 : vector<1x2xf32> to vector<16x2xf32>
    %170 = arith.subf %164, %169 : vector<16x2xf32>
    %171 = math.exp %170 : vector<16x2xf32>
    %cst_64 = arith.constant 0.000000e+00 : f32
    %172 = vector.broadcast %cst_64 : f32 to vector<16x2xf32>
    %173 = arith.select %127, %171, %172 : vector<16x2xi1>, vector<16x2xf32>
    %cst_65 = arith.constant dense<0.000000e+00> : vector<2xf32>
    %174 = vector.multi_reduction <add>, %173, %cst_65 [0] : vector<16x2xf32> to vector<2xf32>
    %175 = vector.shape_cast %174 : vector<2xf32> to vector<1x2xf32>
    %176 = tpu.reciprocal %175 {approx = true} : vector<1x2xf32> -> vector<1x2xf32>
    %177 = vector.broadcast %176 : vector<1x2xf32> to vector<16x2xf32>
    %178 = arith.mulf %173, %177 : vector<16x2xf32>
    %cst_66 = arith.constant dense<0.000000e+00> : vector<16xf32>
    %179 = vector.multi_reduction <add>, %178, %cst_66 [1] : vector<16x2xf32> to vector<16xf32>
    %180 = vector.shape_cast %179 : vector<16xf32> to vector<16x1xf32>
    %181 = vector.broadcast %180 : vector<16x1xf32> to vector<16x32xf32>
    %182 = arith.mulf %181, %123 : vector<16x32xf32>
    %cst_67 = arith.constant dense<0.000000e+00> : vector<2x32xf32>
    %183 = tpu.matmul %125, %182, %cst_67 {dimension_numbers = #tpu.dot_dimension_numbers<[1], [0], [0], [1], [0, 0, 1, 1], [], []>} : vector<2x16xf32>, vector<16x32xf32>, vector<2x32xf32> -> vector<2x32xf32>
    %cst_68 = arith.constant dense<0.000000e+00> : vector<2x128xf32>
    %184 = tpu.matmul %163, %128, %cst_68 {dimension_numbers = #tpu.dot_dimension_numbers<[1], [0], [0], [1], [0, 0, 1, 1], [], []>} : vector<2x32xf32>, vector<32x128xf32>, vector<2x128xf32> -> vector<2x128xf32>
    %cst_69 = arith.constant dense<0.000000e+00> : vector<2x128xf32>
    %185 = tpu.matmul %183, %129, %cst_69 {dimension_numbers = #tpu.dot_dimension_numbers<[1], [0], [0], [1], [0, 0, 1, 1], [], []>} : vector<2x32xf32>, vector<32x128xf32>, vector<2x128xf32> -> vector<2x128xf32>
    %186 = arith.addf %184, %185 : vector<2x128xf32>
    %187 = vector.broadcast %130 : vector<1x128xf32> to vector<2x128xf32>
    %188 = arith.addf %186, %187 : vector<2x128xf32>
    %189 = vector.extract_strided_slice %188 {offsets = [0, 0], sizes = [2, 32], strides = [1, 1]} : vector<2x128xf32> to vector<2x32xf32>
    %190 = arith.negf %189 : vector<2x32xf32>
    %191 = math.exp %190 : vector<2x32xf32>
    %cst_70 = arith.constant 1.000000e+00 : f32
    %192 = vector.broadcast %cst_70 : f32 to vector<2x32xf32>
    %193 = arith.addf %192, %191 : vector<2x32xf32>
    %194 = arith.divf %192, %193 : vector<2x32xf32>
    %195 = vector.extract_strided_slice %188 {offsets = [0, 32], sizes = [2, 32], strides = [1, 1]} : vector<2x128xf32> to vector<2x32xf32>
    %196 = arith.negf %195 : vector<2x32xf32>
    %197 = math.exp %196 : vector<2x32xf32>
    %cst_71 = arith.constant 1.000000e+00 : f32
    %198 = vector.broadcast %cst_71 : f32 to vector<2x32xf32>
    %199 = arith.addf %198, %197 : vector<2x32xf32>
    %200 = arith.divf %198, %199 : vector<2x32xf32>
    %201 = vector.extract_strided_slice %188 {offsets = [0, 64], sizes = [2, 32], strides = [1, 1]} : vector<2x128xf32> to vector<2x32xf32>
    %202 = math.tanh %201 : vector<2x32xf32>
    %203 = vector.extract_strided_slice %188 {offsets = [0, 96], sizes = [2, 32], strides = [1, 1]} : vector<2x128xf32> to vector<2x32xf32>
    %204 = arith.negf %203 : vector<2x32xf32>
    %205 = math.exp %204 : vector<2x32xf32>
    %cst_72 = arith.constant 1.000000e+00 : f32
    %206 = vector.broadcast %cst_72 : f32 to vector<2x32xf32>
    %207 = arith.addf %206, %205 : vector<2x32xf32>
    %208 = arith.divf %206, %207 : vector<2x32xf32>
    %209 = arith.mulf %200, %161 : vector<2x32xf32>
    %210 = arith.mulf %194, %202 : vector<2x32xf32>
    %211 = arith.addf %209, %210 : vector<2x32xf32>
    %212 = math.tanh %211 : vector<2x32xf32>
    %213 = arith.mulf %208, %212 : vector<2x32xf32>
    %cst_73 = arith.constant dense<0.000000e+00> : vector<16x2xf32>
    %214 = tpu.matmul %123, %213, %cst_73 {dimension_numbers = #tpu.dot_dimension_numbers<[1], [1], [0], [0], [0, 0, 1, 0], [], []>} : vector<16x32xf32>, vector<2x32xf32>, vector<16x2xf32> -> vector<16x2xf32>
    %cst_74 = arith.constant -1.000000e+30 : f32
    %215 = vector.broadcast %cst_74 : f32 to vector<16x2xf32>
    %216 = arith.select %127, %214, %215 : vector<16x2xi1>, vector<16x2xf32>
    %cst_75 = arith.constant dense<0xFF800000> : vector<2xf32>
    %217 = vector.multi_reduction <maximumf>, %216, %cst_75 [0] : vector<16x2xf32> to vector<2xf32>
    %218 = vector.shape_cast %217 : vector<2xf32> to vector<1x2xf32>
    %219 = vector.broadcast %218 : vector<1x2xf32> to vector<16x2xf32>
    %220 = arith.subf %214, %219 : vector<16x2xf32>
    %221 = math.exp %220 : vector<16x2xf32>
    %cst_76 = arith.constant 0.000000e+00 : f32
    %222 = vector.broadcast %cst_76 : f32 to vector<16x2xf32>
    %223 = arith.select %127, %221, %222 : vector<16x2xi1>, vector<16x2xf32>
    %cst_77 = arith.constant dense<0.000000e+00> : vector<2xf32>
    %224 = vector.multi_reduction <add>, %223, %cst_77 [0] : vector<16x2xf32> to vector<2xf32>
    %225 = vector.shape_cast %224 : vector<2xf32> to vector<1x2xf32>
    %226 = tpu.reciprocal %225 {approx = true} : vector<1x2xf32> -> vector<1x2xf32>
    %227 = vector.broadcast %226 : vector<1x2xf32> to vector<16x2xf32>
    %228 = arith.mulf %223, %227 : vector<16x2xf32>
    %cst_78 = arith.constant dense<0.000000e+00> : vector<16xf32>
    %229 = vector.multi_reduction <add>, %228, %cst_78 [1] : vector<16x2xf32> to vector<16xf32>
    %230 = vector.shape_cast %229 : vector<16xf32> to vector<16x1xf32>
    %231 = vector.broadcast %230 : vector<16x1xf32> to vector<16x32xf32>
    %232 = arith.mulf %231, %123 : vector<16x32xf32>
    %cst_79 = arith.constant dense<0.000000e+00> : vector<2x32xf32>
    %233 = tpu.matmul %125, %232, %cst_79 {dimension_numbers = #tpu.dot_dimension_numbers<[1], [0], [0], [1], [0, 0, 1, 1], [], []>} : vector<2x16xf32>, vector<16x32xf32>, vector<2x32xf32> -> vector<2x32xf32>
    %cst_80 = arith.constant dense<0.000000e+00> : vector<2x128xf32>
    %234 = tpu.matmul %213, %128, %cst_80 {dimension_numbers = #tpu.dot_dimension_numbers<[1], [0], [0], [1], [0, 0, 1, 1], [], []>} : vector<2x32xf32>, vector<32x128xf32>, vector<2x128xf32> -> vector<2x128xf32>
    %cst_81 = arith.constant dense<0.000000e+00> : vector<2x128xf32>
    %235 = tpu.matmul %233, %129, %cst_81 {dimension_numbers = #tpu.dot_dimension_numbers<[1], [0], [0], [1], [0, 0, 1, 1], [], []>} : vector<2x32xf32>, vector<32x128xf32>, vector<2x128xf32> -> vector<2x128xf32>
    %236 = arith.addf %234, %235 : vector<2x128xf32>
    %237 = vector.broadcast %130 : vector<1x128xf32> to vector<2x128xf32>
    %238 = arith.addf %236, %237 : vector<2x128xf32>
    %239 = vector.extract_strided_slice %238 {offsets = [0, 0], sizes = [2, 32], strides = [1, 1]} : vector<2x128xf32> to vector<2x32xf32>
    %240 = arith.negf %239 : vector<2x32xf32>
    %241 = math.exp %240 : vector<2x32xf32>
    %cst_82 = arith.constant 1.000000e+00 : f32
    %242 = vector.broadcast %cst_82 : f32 to vector<2x32xf32>
    %243 = arith.addf %242, %241 : vector<2x32xf32>
    %244 = arith.divf %242, %243 : vector<2x32xf32>
    %245 = vector.extract_strided_slice %238 {offsets = [0, 32], sizes = [2, 32], strides = [1, 1]} : vector<2x128xf32> to vector<2x32xf32>
    %246 = arith.negf %245 : vector<2x32xf32>
    %247 = math.exp %246 : vector<2x32xf32>
    %cst_83 = arith.constant 1.000000e+00 : f32
    %248 = vector.broadcast %cst_83 : f32 to vector<2x32xf32>
    %249 = arith.addf %248, %247 : vector<2x32xf32>
    %250 = arith.divf %248, %249 : vector<2x32xf32>
    %251 = vector.extract_strided_slice %238 {offsets = [0, 64], sizes = [2, 32], strides = [1, 1]} : vector<2x128xf32> to vector<2x32xf32>
    %252 = math.tanh %251 : vector<2x32xf32>
    %253 = vector.extract_strided_slice %238 {offsets = [0, 96], sizes = [2, 32], strides = [1, 1]} : vector<2x128xf32> to vector<2x32xf32>
    %254 = arith.negf %253 : vector<2x32xf32>
    %255 = math.exp %254 : vector<2x32xf32>
    %cst_84 = arith.constant 1.000000e+00 : f32
    %256 = vector.broadcast %cst_84 : f32 to vector<2x32xf32>
    %257 = arith.addf %256, %255 : vector<2x32xf32>
    %258 = arith.divf %256, %257 : vector<2x32xf32>
    %259 = arith.mulf %250, %211 : vector<2x32xf32>
    %260 = arith.mulf %244, %252 : vector<2x32xf32>
    %261 = arith.addf %259, %260 : vector<2x32xf32>
    %262 = math.tanh %261 : vector<2x32xf32>
    %263 = arith.mulf %258, %262 : vector<2x32xf32>
    %cst_85 = arith.constant dense<0.000000e+00> : vector<16x2xf32>
    %264 = tpu.matmul %123, %263, %cst_85 {dimension_numbers = #tpu.dot_dimension_numbers<[1], [1], [0], [0], [0, 0, 1, 0], [], []>} : vector<16x32xf32>, vector<2x32xf32>, vector<16x2xf32> -> vector<16x2xf32>
    %cst_86 = arith.constant -1.000000e+30 : f32
    %265 = vector.broadcast %cst_86 : f32 to vector<16x2xf32>
    %266 = arith.select %127, %264, %265 : vector<16x2xi1>, vector<16x2xf32>
    %cst_87 = arith.constant dense<0xFF800000> : vector<2xf32>
    %267 = vector.multi_reduction <maximumf>, %266, %cst_87 [0] : vector<16x2xf32> to vector<2xf32>
    %268 = vector.shape_cast %267 : vector<2xf32> to vector<1x2xf32>
    %269 = vector.broadcast %268 : vector<1x2xf32> to vector<16x2xf32>
    %270 = arith.subf %264, %269 : vector<16x2xf32>
    %271 = math.exp %270 : vector<16x2xf32>
    %cst_88 = arith.constant 0.000000e+00 : f32
    %272 = vector.broadcast %cst_88 : f32 to vector<16x2xf32>
    %273 = arith.select %127, %271, %272 : vector<16x2xi1>, vector<16x2xf32>
    %cst_89 = arith.constant dense<0.000000e+00> : vector<2xf32>
    %274 = vector.multi_reduction <add>, %273, %cst_89 [0] : vector<16x2xf32> to vector<2xf32>
    %275 = vector.shape_cast %274 : vector<2xf32> to vector<1x2xf32>
    %276 = tpu.reciprocal %275 {approx = true} : vector<1x2xf32> -> vector<1x2xf32>
    %277 = vector.broadcast %276 : vector<1x2xf32> to vector<16x2xf32>
    %278 = arith.mulf %273, %277 : vector<16x2xf32>
    %cst_90 = arith.constant dense<0.000000e+00> : vector<16xf32>
    %279 = vector.multi_reduction <add>, %278, %cst_90 [1] : vector<16x2xf32> to vector<16xf32>
    %280 = vector.shape_cast %279 : vector<16xf32> to vector<16x1xf32>
    %281 = vector.broadcast %280 : vector<16x1xf32> to vector<16x32xf32>
    %282 = arith.mulf %281, %123 : vector<16x32xf32>
    %cst_91 = arith.constant dense<0.000000e+00> : vector<2x32xf32>
    %283 = tpu.matmul %125, %282, %cst_91 {dimension_numbers = #tpu.dot_dimension_numbers<[1], [0], [0], [1], [0, 0, 1, 1], [], []>} : vector<2x16xf32>, vector<16x32xf32>, vector<2x32xf32> -> vector<2x32xf32>
    %c0_92 = arith.constant 0 : index
    %c0_93 = arith.constant 0 : index
    %284 = vector.load %arg10[%c0_92, %c0_93] : memref<64x32xf32, #tpu.memory_space<vmem>>, vector<64x32xf32>
    %285 = vector.extract_strided_slice %284 {offsets = [0, 0], sizes = [32, 32], strides = [1, 1]} : vector<64x32xf32> to vector<32x32xf32>
    %cst_94 = arith.constant dense<0.000000e+00> : vector<2x32xf32>
    %286 = tpu.matmul %263, %285, %cst_94 {dimension_numbers = #tpu.dot_dimension_numbers<[1], [0], [0], [1], [0, 0, 1, 1], [], []>} : vector<2x32xf32>, vector<32x32xf32>, vector<2x32xf32> -> vector<2x32xf32>
    %287 = vector.extract_strided_slice %284 {offsets = [32, 0], sizes = [32, 32], strides = [1, 1]} : vector<64x32xf32> to vector<32x32xf32>
    %cst_95 = arith.constant dense<0.000000e+00> : vector<2x32xf32>
    %288 = tpu.matmul %283, %287, %cst_95 {dimension_numbers = #tpu.dot_dimension_numbers<[1], [0], [0], [1], [0, 0, 1, 1], [], []>} : vector<2x32xf32>, vector<32x32xf32>, vector<2x32xf32> -> vector<2x32xf32>
    %289 = arith.addf %286, %288 : vector<2x32xf32>
    %c0_96 = arith.constant 0 : index
    %c0_97 = arith.constant 0 : index
    %290 = vector.load %arg11[%c0_96, %c0_97] : memref<1x32xf32, #tpu.memory_space<vmem>>, vector<1x32xf32>
    %291 = vector.broadcast %290 : vector<1x32xf32> to vector<2x32xf32>
    %292 = arith.addf %289, %291 : vector<2x32xf32>
    %cst_98 = arith.constant 0.000000e+00 : f32
    %293 = vector.broadcast %cst_98 : f32 to vector<2x32xf32>
    %294 = arith.maximumf %292, %293 : vector<2x32xf32>
    %c0_99 = arith.constant 0 : index
    %c0_100 = arith.constant 0 : index
    %295 = vector.load %arg12[%c0_99, %c0_100] : memref<32x128xf32, #tpu.memory_space<vmem>>, vector<32x128xf32>
    %cst_101 = arith.constant dense<0.000000e+00> : vector<2x128xf32>
    %296 = tpu.matmul %294, %295, %cst_101 {dimension_numbers = #tpu.dot_dimension_numbers<[1], [0], [0], [1], [0, 0, 1, 1], [], []>} : vector<2x32xf32>, vector<32x128xf32>, vector<2x128xf32> -> vector<2x128xf32>
    %c0_102 = arith.constant 0 : index
    %c0_103 = arith.constant 0 : index
    %297 = vector.load %arg13[%c0_102, %c0_103] : memref<1x128xf32, #tpu.memory_space<vmem>>, vector<1x128xf32>
    %298 = vector.broadcast %297 : vector<1x128xf32> to vector<2x128xf32>
    %299 = arith.addf %296, %298 : vector<2x128xf32>
    %c0_104 = arith.constant 0 : index
    %c0_105 = arith.constant 0 : index
    %300 = vector.load %arg14[%c0_104, %c0_105] : memref<2x128xf32, #tpu.memory_space<vmem>>, vector<2x128xf32>
    tpu.vector_store %arg14[%c0_104, %c0_105], %299 {strides = array<i32>} : memref<2x128xf32, #tpu.memory_space<vmem>>, vector<2x128xf32>,
    return
  }
}

</mosaic_0001>

<bundles_post_ra>
// kernel: net_forward.1
= control target key start
LH: loop header
LB: loop body
LE: loop exit
PB: predicated region body
PF: predicated region fallthrough
CT: control target
= control target key end

     0   :  { %v2729_v2 = vmov 0.0   ;;  %vm2730_vm0 = vmmov 0   ;;  %s3257_s0 = inlined_call_operand.vmem [shape: f32[16,32], index: 0, kind: input, shape index: {}]   ;;  %s3258_s1 = inlined_call_operand.vmem [shape: bf16[16,16], index: 1, kind: input, shape index: {}]   ;;  %s3259_s2 = inlined_call_operand.vmem [shape: f32[16,2], index: 2, kind: input, shape index: {}]   ;;  %s3260_s3 = inlined_call_operand.vmem [shape: f32[2,16], index: 3, kind: input, shape index: {}]   ;;  %s3261_s4 = inlined_call_operand.vmem [shape: f32[3,32,32], index: 4, kind: input, shape index: {}]   ;;  %s3262_s5 = inlined_call_operand.vmem [shape: f32[3,32,32], index: 5, kind: input, shape index: {}]   ;;  %s3263_s6 = inlined_call_operand.vmem [shape: f32[3,5,32], index: 6, kind: input, shape index: {}]   ;;  %s3264_s7 = inlined_call_operand.vmem [shape: f32[32,128], index: 7, kind: input, shape index: {}]   ;;  %s3265_s8 = inlined_call_operand.vmem [shape: f32[32,128], index: 8, kind: input, shape index: {}]   ;;  %s3266_s9 = inlined_call_operand.vmem [shape: f32[1,128], index: 9, kind: input, shape index: {}]   ;;  %s3267_s10 = inlined_call_operand.vmem [shape: f32[64,32], index: 10, kind: input, shape index: {}]   ;;  %s3268_s11 = inlined_call_operand.vmem [shape: f32[1,32], index: 11, kind: input, shape index: {}]   ;;  %s3269_s12 = inlined_call_operand.vmem [shape: f32[32,128], index: 12, kind: input, shape index: {}]   ;;  %s3270_s13 = inlined_call_operand.vmem [shape: f32[1,128], index: 13, kind: input, shape index: {}]   ;;  %s3271_s14 = inlined_call_operand.hbm [shape: f32[2,128], index: 14, kind: output, shape index: {}]  }
   0x1   :  { %v51_v0 = vld [vmem:[%s3257_s0] sm:$0xff]  ;;  %v52_v1 = vld [vmem:[%s3257_s0 + $0x8] sm:$0xff]  ;;  %2326 = vmatprep.subr.bf16.mxu0 %v2729_v2  ;;  %2328 = vmatprep.mubr.msk.bf16.mxu0 %vm2730_vm0, %v2729_v2 }
   0x2   :  { %v54_v3 = vpack.c.bf16 %v52_v1, %v51_v0  ;;  %v111_v4 = vld [vmem:[%s3261_s4] sm:$0xff]  ;;  %v112_v6 = vld [vmem:[%s3261_s4 + $0x8] sm:$0xff] }
   0x3   :  { %v2825_v5 = vld [vmem:[%s3258_s1] sm:$0xff]  }
   0x4   :  { %19 = vsyncpa [#allocation3], 0  ;;  %2327 = vmatpush3.bf16.msra.mxu0 %v54_v3  ;;  %vm66_vm1 = vcmask 130048   ;;  %v2545_v7 = vpack.c.bf16 %v112_v6, %v111_v4  ;;  %v113_v8 = vld [vmem:[%s3261_s4 + $0x10] sm:$0xff]  ;;  %v114_v9 = vld [vmem:[%s3261_s4 + $0x18] sm:$0xff]  ;;  %v55_v14 = vlaneseq  ;;  %vm119_vm2 = vcmask 261120  }
   0x5   :  { %v2549_v10 = vpack.c.bf16 %v114_v9, %v113_v8  ;;  %v203_v11 = vld [vmem:[%s3262_s5] sm:$0xff]  ;;  %v204_v12 = vld [vmem:[%s3262_s5 + $0x8] sm:$0xff]  ;;  %v205_v27 = vld [vmem:[%s3262_s5 + $0x10] sm:$0xff]  ;;  %s2732_s30 = smov 64   ;;  %vm1078_vm4 = vcmask 15360   ;;  %s2734_s18 = smov [#allocation2]  }
   0x6   :  { %2546 = vmatprep.subr.bf16.mxu1 %v2545_v7  ;;  %v2553_v13 = vpack.c.bf16 %v204_v12, %v203_v11  ;;  %v56_v15 = vshrl.u32 %v55_v14, 7  ;;  %v53_v17 = vld [vmem:[%s3263_s6] sm:$0x1f]  ;;  %v206_v28 = vld [vmem:[%s3262_s5 + $0x18] sm:$0xff]  ;;  %v2171_v39 = vld [vmem:[%s3261_s4 + $0x28] sm:$0xff]  ;;  %s2154_s19 = sshll.u32 %s2734_s18, 4  ;;  %s2155_s19 = int_to_ptr.vmem [resolvable:$true] %s2154_s19 }
   0x7   :  { %2329 = vmatmul.mubr.msk.bf16.vlgmr.msra.gmra.mrb[0].mxu0 %vm66_vm1, %v2825_v5  ;;  %2548 = vmatpush3.bf16.msra.mxu1 %v2545_v7  ;;  %v2557_v29 = vpack.c.bf16 %v206_v28, %v205_v27  ;;  %v2170_v38 = vld [vmem:[%s3261_s4 + $0x20] sm:$0xff]  ;;  %v2172_v58 = vld [vmem:[%s3261_s4 + $0x30] sm:$0xff]  ;;  %v2173_v59 = vld [vmem:[%s3261_s4 + $0x38] sm:$0xff]  ;;  %p2710_p1 = scmp.lt.s32.totalorder %s2155_s19, %s2155_s19 }
   0x8   :  { %2550 = vmatprep.subr.bf16.mxu1 %v2549_v10  ;;  %2554 = vmatprep.subr.bf16.mxu0 %v2553_v13  ;;  %v2845_v16 = vsub.s32 0, %v56_v15  ;;  %v2861_v30 = vsub.s32 1, %v56_v15  ;;  %v2561_v40 = vpack.c.bf16 %v2171_v39, %v2170_v38  ;;  %v2872_v41 = vsub.s32 2, %v56_v15  ;;  %v2176_v61 = vld [vmem:[%s3262_s5 + $0x20] sm:$0xff]  ;;  %v2177_v62 = vld [vmem:[%s3262_s5 + $0x28] sm:$0xff]  ;;  %v2178_v12 = vld [vmem:[%s3262_s5 + $0x30] sm:$0xff] }
   0x9   :  { %2556 = vmatpush3.bf16.msra.mxu0 %v2553_v13  ;;  %v2875_v43 = vsub.s32 3, %v56_v15  ;;  %v2877_v44 = vsub.s32 4, %v56_v15  ;;  %v2565_v60 = vpack.c.bf16 %v2173_v59, %v2172_v58  ;;  %v2569_v63 = vpack.c.bf16 %v2177_v62, %v2176_v61  ;;  %v2179_v13 = vld [vmem:[%s3262_s5 + $0x38] sm:$0xff] }
   0xa   :  { %v58_v18 = vrot.slane %v53_v17, %v2845_v16  ;;  %2558 = vmatprep.subr.bf16.mxu0 %v2557_v29  ;;  %v118_v31 = vrot.slane %v53_v17, %v2861_v30  ;;  %v210_v42 = vrot.slane %v53_v17, %v2872_v41  ;;  %v2573_v14 = vpack.c.bf16 %v2179_v13, %v2178_v12  ;;  %v2193_v61 = vld [vmem:[%s3262_s5 + $0x58] sm:$0xff]  ;;  %v807_v12 = vld [vmem:[%s3264_s7] sm:$0xff]  ;;  %v808_v13 = vld [vmem:[%s3264_s7 + $0x8] sm:$0xff] }
   0xb   :  { %2552 = vmatpush3.bf16.msra.mxu1 %v2549_v10  ;;  %v297_v47 = vrot.slane %v53_v17, %v2875_v43  ;;  %v303_v51 = vrot.slane %v53_v17, %v2877_v44 }
   0xc   :  { %2354 = vmatprep.subr.bf16.mxu1 %v2729_v2  ;;  %v59_v19 = vmul.f32 %v58_v18, %v51_v0  ;;  %v60_v20 = vmul.f32 %v58_v18, %v52_v1  ;;  %v2168_v0 = vld [vmem:[%s3263_s6 + $0x8] sm:$0x1f] }
   0xd   :  { %2560 = vmatpush3.bf16.msra.mxu0 %v2557_v29  ;;  %v312_v1 = vrot.slane %v2168_v0, %v2845_v16  ;;  %v364_v15 = vrot.slane %v2168_v0, %v2861_v30  ;;  %v543_v29 = vrot.slane %v2168_v0, %v2875_v43 }
   0xe   :  { %2562 = vmatprep.subr.bf16.mxu0 %v2561_v40 }
  0xda   :  { %v104_v21 = vpop.f32.mrb[0].mxu0 }
  0xdb   :  { %v105_v22 = vadd.f32 %v104_v21, %v59_v19  ;;  %v2330_v23 = vpop.f32.mrb[1].mxu0 }
  0xdc   :  { %v107_v24 = vpop.f32.mrb[2].mxu0  ;;  %v2184_v23 = vld [vmem:[%s3261_s4 + $0x40] sm:$0xff] }
  0xdd   :  { %v108_v25 = vadd.f32 %v107_v24, %v60_v20  ;;  %v2331_v26 = vpop.f32.mrb[3].mxu0  ;;  %2340 = vmatprep.mubr.msk.f32.mxu1 %vm119_vm2, %v105_v22  ;;  %v2185_v24 = vld [vmem:[%s3261_s4 + $0x48] sm:$0xff] }
  0xde   :  { %v456_v26 = vrot.slane %v2168_v0, %v2872_v41 }
  0xdf   :  { %2341 = vmatmul.mubr.msk.f32.vlgmr.msra.gmra.mrb[0].mxu1 %vm119_vm2, %v108_v25  ;;  %v2577_v25 = vpack.c.bf16 %v2185_v24, %v2184_v23 }
  0xe0   :  { %2356 = vmatprep.mubr.msk.bf16.mxu1 %vm2730_vm0, %v2729_v2 }
 0x1b2   :  { %v2342_v32 = vpop.f32.mrb[0].mxu1 }
 0x1b3   :  { %v198_v33 = vadd.f32 %v2342_v32, %v118_v31  ;;  %v192_v34 = vpop.f32.mrb[1].mxu1 }
 0x1b4   :  { %v193_v35 = vadd.f32 %v192_v34, %v118_v31  ;;  %v549_v34 = vrot.slane %v2168_v0, %v2877_v44  ;;  %v812_v0 = vld [vmem:[%s3265_s8 + $0x8] sm:$0xff] }
 0x1b5   :  { %v202_v37 = vmax.f32 %v198_v33, 0.0 }
 0x1b6   :  { %v201_v36 = vmax.f32 %v193_v35, 0.0 }
 0x1b8   :  { %2351 = vmatprep.mubr.msk.f32.mxu0 %vm119_vm2, %v201_v36 }
 0x1b9   :  { %2352 = vmatmul.mubr.msk.f32.vlgmr.msra.gmra.mrb[4].mxu0 %vm119_vm2, %v202_v37 }
 0x1ba   :  { %2564 = vmatpush3.bf16.msra.mxu0 %v2561_v40 }
 0x1bb   :  { %2566 = vmatprep.subr.bf16.mxu0 %v2565_v60 }
 0x1be   :  { %2568 = vmatpush3.bf16.msra.mxu0 %v2565_v60 }
 0x1bf   :  { %2382 = vmatprep.subr.bf16.mxu0 %v2729_v2 }
 0x28c   :  { %v2353_v45 = vpop.f32.mrb[4].mxu0 }
 0x28d   :  { %v289_v46 = vadd.f32 %v2353_v45, %v210_v42  ;;  %v283_v48 = vpop.f32.mrb[5].mxu0  ;;  %v2187_v45 = vld [vmem:[%s3261_s4 + $0x58] sm:$0xff] }
 0x28e   :  { %v284_v49 = vadd.f32 %v283_v48, %v210_v42  ;;  %v2186_v42 = vld [vmem:[%s3261_s4 + $0x50] sm:$0xff]  ;;  %v2191_v48 = vld [vmem:[%s3262_s5 + $0x48] sm:$0xff] }
 0x28f   :  { %v293_v50 = vmax.f32 %v289_v46, 0.0  ;;  %v2581_v46 = vpack.c.bf16 %v2187_v45, %v2186_v42 }
 0x290   :  { %v292_v52 = vmax.f32 %v284_v49, 0.0  ;;  %v2182_v49 = vld [vmem:[%s3263_s6 + $0x10] sm:$0x1f] }
 0x291   :  { %v299_v53 = vmul.f32 %v297_v47, %v293_v50  ;;  %v560_v50 = vrot.slane %v2182_v49, %v2845_v16  ;;  %v2192_v16 = vld [vmem:[%s3262_s5 + $0x50] sm:$0xff]  ;;  %v704_v23 = vrot.slane %v2182_v49, %v2872_v41 }
 0x292   :  { %v298_v54 = vmul.f32 %v297_v47, %v292_v52  ;;  %v2190_v47 = vld [vmem:[%s3262_s5 + $0x40] sm:$0xff]  ;;  %v2589_v62 = vpack.c.bf16 %v2193_v61, %v2192_v16 }
 0x293   :  { %v2881_v55 = vadd.f32 %v303_v51, %v299_v53 }
 0x294   :  { %v2883_v56 = vadd.f32 %v303_v51, %v298_v54 }
 0x295   :  { %v314_v8 = vmul.f32 %v312_v1, %v2881_v55 }
 0x296   :  { %v308_v57 = vpack.c.bf16 %v2881_v55, %v2883_v56  ;;  %v313_v3 = vmul.f32 %v312_v1, %v2883_v56 }
 0x298   :  { %2355 = vmatpush3.bf16.msra.mxu1 %v308_v57 }
 0x299   :  { %2570 = vmatprep.subr.bf16.mxu1 %v2569_v63 }
 0x29b   :  { %2357 = vmatmul.mubr.msk.bf16.vlgmr.msra.gmra.mrb[4].mxu1 %vm66_vm1, %v2825_v5 }
 0x29c   :  { %2572 = vmatpush3.bf16.msra.mxu1 %v2569_v63  ;;  %v811_v63 = vld [vmem:[%s3265_s8] sm:$0xff] }
 0x29d   :  { %2574 = vmatprep.subr.bf16.mxu1 %v2573_v14  ;;  %v2972_v1 = vpack.c.bf16 %v812_v0, %v811_v63 }
 0x2a0   :  { %2576 = vmatpush3.bf16.msra.mxu1 %v2573_v14 }
 0x2a1   :  { %2578 = vmatprep.subr.bf16.mxu1 %v2577_v25 }
 0x36e   :  { %v349_v4 = vpop.f32.mrb[4].mxu1 }
 0x36f   :  { %v350_v6 = vadd.f32 %v349_v4, %v313_v3  ;;  %v2358_v7 = vpop.f32.mrb[5].mxu1  ;;  %v2731_v3 = vmov 0.0|0.0   ;;  %v813_v4 = vld [vmem:[%s3265_s8 + $0x10] sm:$0xff] }
 0x370   :  { %v352_v9 = vpop.f32.mrb[6].mxu1 }
 0x371   :  { %v353_v10 = vadd.f32 %v352_v9, %v314_v8  ;;  %v2359_v11 = vpop.f32.mrb[7].mxu1  ;;  %2368 = vmatprep.mubr.msk.f32.mxu0 %vm119_vm2, %v350_v6  ;;  %v814_v6 = vld [vmem:[%s3265_s8 + $0x18] sm:$0xff]  ;;  %v612_v8 = vrot.slane %v2182_v49, %v2861_v30  ;;  %v809_v30 = vld [vmem:[%s3264_s7 + $0x10] sm:$0xff] }
 0x372   :  { %v2984_v7 = vpack.c.bf16 %v814_v6, %v813_v4 }
 0x373   :  { %2369 = vmatmul.mubr.msk.f32.vlgmr.msra.gmra.mrb[6].mxu0 %vm119_vm2, %v353_v10 }
 0x374   :  { %2384 = vmatprep.mubr.msk.bf16.mxu0 %vm2730_vm0, %v2729_v2 }
 0x446   :  { %v2370_v17 = vpop.f32.mrb[6].mxu0 }
 0x447   :  { %v443_v18 = vadd.f32 %v2370_v17, %v364_v15  ;;  %v437_v19 = vpop.f32.mrb[7].mxu0  ;;  %v2995_v17 = vpack.c.bf16 %v808_v13, %v807_v12 }
 0x448   :  { %v438_v20 = vadd.f32 %v437_v19, %v364_v15  ;;  %v810_v19 = vld [vmem:[%s3264_s7 + $0x18] sm:$0xff] }
 0x449   :  { %v447_v22 = vmax.f32 %v443_v18, 0.0 }
 0x44a   :  { %v446_v21 = vmax.f32 %v438_v20, 0.0  ;;  %v3006_v20 = vpack.c.bf16 %v810_v19, %v809_v30 }
 0x44c   :  { %2379 = vmatprep.mubr.msk.f32.mxu1 %vm119_vm2, %v446_v21 }
 0x44d   :  { %2380 = vmatmul.mubr.msk.f32.vlgmr.msra.gmra.mrb[2].mxu1 %vm119_vm2, %v447_v22 }
 0x44e   :  { %2580 = vmatpush3.bf16.msra.mxu1 %v2577_v25 }
 0x44f   :  { %2582 = vmatprep.subr.bf16.mxu1 %v2581_v46 }
 0x452   :  { %2584 = vmatpush3.bf16.msra.mxu1 %v2581_v46 }
 0x453   :  { %2593 = vmatprep.subr.bf16.mxu1 %v2731_v3 }
 0x520   :  { %v2381_v27 = vpop.f32.mrb[2].mxu1 }
 0x521   :  { %v535_v28 = vadd.f32 %v2381_v27, %v456_v26  ;;  %v529_v31 = vpop.f32.mrb[3].mxu1 }
 0x522   :  { %v530_v32 = vadd.f32 %v529_v31, %v456_v26  ;;  %v791_v26 = vrot.slane %v2182_v49, %v2875_v43  ;;  %v797_v31 = vrot.slane %v2182_v49, %v2877_v44  ;;  %v3026_v43 = vld [vmem:[%s3266_s9] ss:$0 sm:$0xff]  ;;  %s2733_s9 = smov 32  }
 0x523   :  { %v539_v33 = vmax.f32 %v535_v28, 0.0 }
 0x524   :  { %v538_v35 = vmax.f32 %v530_v32, 0.0 }
 0x525   :  { %v545_v36 = vmul.f32 %v543_v29, %v539_v33 }
 0x526   :  { %v544_v37 = vmul.f32 %v543_v29, %v538_v35 }
 0x527   :  { %v2930_v38 = vadd.f32 %v549_v34, %v545_v36 }
 0x528   :  { %v2932_v39 = vadd.f32 %v549_v34, %v544_v37 }
 0x529   :  { %v562_v57 = vmul.f32 %v560_v50, %v2930_v38  ;;  %v553_v35 = vmax.f32 %v2881_v55, %v2930_v38 }
 0x52a   :  { %v556_v40 = vpack.c.bf16 %v2930_v38, %v2932_v39  ;;  %v561_v51 = vmul.f32 %v560_v50, %v2932_v39  ;;  %v552_v37 = vmax.f32 %v2883_v56, %v2932_v39 }
 0x52c   :  { %2383 = vmatpush3.bf16.msra.mxu0 %v556_v40 }
 0x52f   :  { %2385 = vmatmul.mubr.msk.bf16.vlgmr.msra.gmra.mrb[8].mxu0 %vm66_vm1, %v2825_v5  ;;  %v2585_v5 = vpack.c.bf16 %v2191_v48, %v2190_v47 }
 0x531   :  { %2586 = vmatprep.subr.bf16.mxu0 %v2585_v5 }
 0x532   :  { %2588 = vmatpush3.bf16.msra.mxu0 %v2585_v5 }
 0x533   :  { %2590 = vmatprep.subr.bf16.mxu0 %v2589_v62 }
 0x536   :  { %2592 = vmatpush3.bf16.msra.mxu0 %v2589_v62 }
 0x537   :  { %2599 = vmatprep.subr.bf16.mxu0 %v2731_v3 }
 0x602   :  { %v597_v52 = vpop.f32.mrb[8].mxu0 }
 0x603   :  { %v598_v53 = vadd.f32 %v597_v52, %v561_v51  ;;  %v2386_v54 = vpop.f32.mrb[9].mxu0 }
 0x604   :  { %v600_v58 = vpop.f32.mrb[10].mxu0 }
 0x605   :  { %v601_v59 = vadd.f32 %v600_v58, %v562_v57  ;;  %v2387_v60 = vpop.f32.mrb[11].mxu0  ;;  %2396 = vmatprep.mubr.msk.f32.mxu1 %vm119_vm2, %v598_v53 }
 0x606   :  { %v3064_v60 = vld [vmem:[%s3259_s2] sm:$0xff] }
 0x607   :  { %2397 = vmatmul.mubr.msk.f32.vlgmr.msra.gmra.mrb[8].mxu1 %vm119_vm2, %v601_v59  ;;  %v3059_v59 = vld [vmem:[%s3259_s2 + $0x8] sm:$0xff]  ;;  %vm805_vm5 = vcmp.gt.f32.partialorder %v3064_v60, 0.0 }
 0x608   :  { %2418 = vmatprep.mubr.msk.f32.mxu1 %vm2730_vm0, %v2729_v2  ;;  %2595 = vmatpush3.bf16.msra.mxu1 %v2972_v1  ;;  %vm806_vm3 = vcmp.gt.f32.partialorder %v3059_v59, 0.0 }
 0x609   :  { %2596 = vmatprep.subr.bf16.mxu1 %v2731_v3 }
 0x60c   :  { %2598 = vmatpush3.bf16.msra.mxu1 %v2984_v7 }
 0x60f   :  { %2419 = vmatmul.mubr.f32.vlgmr.msra.gmra.mrb[10].mxu1 %v2729_v2 }
 0x6da   :  { %v2398_v9 = vpop.f32.mrb[8].mxu1 }
 0x6db   :  { %v691_v10 = vadd.f32 %v2398_v9, %v612_v8  ;;  %v685_v11 = vpop.f32.mrb[9].mxu1 }
 0x6dc   :  { %v686_v14 = vadd.f32 %v685_v11, %v612_v8 }
 0x6dd   :  { %v695_v18 = vmax.f32 %v691_v10, 0.0 }
 0x6de   :  { %v694_v15 = vmax.f32 %v686_v14, 0.0 }
 0x6e0   :  { %2407 = vmatprep.mubr.msk.f32.mxu0 %vm119_vm2, %v694_v15 }
 0x6e1   :  { %2408 = vmatmul.mubr.msk.f32.vlgmr.msra.gmra.mrb[12].mxu0 %vm119_vm2, %v695_v18 }
 0x6e2   :  { %2601 = vmatpush3.bf16.msra.mxu0 %v2995_v17  ;;  %2429 = vmatprep.mubr.msk.f32.mxu0 %vm2730_vm0, %v2729_v2  ;;  %v885_v21 = vpop.f32.mrb[10].mxu1 }
 0x6e3   :  { %2602 = vmatprep.subr.bf16.mxu0 %v2731_v3  ;;  %v2420_v22 = vpop.f32.mrb[11].mxu1 }
 0x6e6   :  { %2604 = vmatpush3.bf16.msra.mxu0 %v3006_v20 }
 0x6e7   :  { %2605 = vmatprep.subr.bf16.mxu0 %v2731_v3 }
 0x6e9   :  { %2430 = vmatmul.mubr.f32.vlgmr.msra.gmra.mrb[14].mxu0 %v2729_v2 }
 0x6ea   :  { %2441 = vmatprep.mubr.msk.f32.mxu0 %vm2730_vm0, %v2729_v2 }
 0x7b4   :  { %v2409_v24 = vpop.f32.mrb[12].mxu0 }
 0x7b5   :  { %v783_v25 = vadd.f32 %v2409_v24, %v704_v23  ;;  %v777_v27 = vpop.f32.mrb[13].mxu0 }
 0x7b6   :  { %v778_v28 = vadd.f32 %v777_v27, %v704_v23 }
 0x7b7   :  { %v787_v29 = vmax.f32 %v783_v25, 0.0 }
 0x7b8   :  { %v786_v32 = vmax.f32 %v778_v28, 0.0 }
 0x7b9   :  { %v793_v33 = vmul.f32 %v791_v26, %v787_v29 }
 0x7ba   :  { %v792_v34 = vmul.f32 %v791_v26, %v786_v32 }
 0x7bb   :  { %v799_v36 = vadd.f32 %v797_v31, %v793_v33 }
 0x7bc   :  { %v798_v41 = vadd.f32 %v797_v31, %v792_v34  ;;  %v955_v40 = vpop.f32.mrb[14].mxu0 }
 0x7bd   :  { %v3028_v42 = vmax.f32 %v553_v35, %v799_v36  ;;  %v956_v44 = vadd.f32 %v955_v40, %v885_v21  ;;  %v2431_v45 = vpop.f32.mrb[15].mxu0 }
 0x7be   :  { %v3030_v46 = vmax.f32 %v552_v37, %v798_v41 }
 0x7bf   :  { %v965_v47 = vadd.f32 %v3026_v43, %v956_v44 }
 0x7c0   :  { %2434 = vmatprep.mubr.msk.f32.mxu1 %vm119_vm2, %v3030_v46 }
 0x7c1   :  { %2663 = vtanh.f32 %v965_v47  ;;  %v2197_v56 = vmul.f32 -1.442695, %v965_v47 }
 0x7c3   :  { %2665 = vpow2.f32 %v2197_v56  ;;  %v3087_v56 = vld [vmem:[%s3260_s3] sm:$0x3] }
 0x7cb   :  { %v2664_v55 = vpop.eup %2663 }
 0x7cc   :  { %975 = vrot.lane.b32.xlu0 %v2664_v55, %s2732_s30 }
 0x7cd   :  { %v2666_v38 = vpop.eup %2665 }
 0x7ce   :  { %v969_v39 = vadd.f32 1.0, %v2666_v38 }
 0x7d0   :  { %2667 = vrcp.f32 %v969_v39 }
 0x7da   :  { %v2668_v48 = vpop.eup %2667 }
 0x7db   :  { %v973_v50 = vmul.f32 0.0, %v2668_v48 }
 0x83e   :  { %v976_v5 = vpop.permute.xlu0 %975 }
 0x83f   :  { %v978_v49 = vmul.f32 %v2668_v48, %v976_v5 }
 0x841   :  { %980 = vrot.lane.b32.xlu0 %v978_v49, %s2733_s9 }
 0x8b3   :  { %v981_v51 = vpop.permute.xlu0 %980 }
 0x8b4   :  { %v3037_v52 = vadd.f32 %v981_v51, %v973_v50 }
 0x8b6   :  { %2669 = vtanh.f32 %v3037_v52 }
 0x8c0   :  { %v2670_v53 = vpop.eup %2669 }
 0x8c1   :  { %986 = vrot.lane.b32.xlu1 %v2670_v53, %s2732_s30 }
 0x933   :  { %v987_v54 = vpop.permute.xlu1 %986 }
 0x934   :  { %v989_v57 = vmul.f32 %v2668_v48, %v987_v54 }
 0x936   :  { %991 = vrot.lane.b32.xlu1 %v989_v57, %s2733_s9 }
 0x9a8   :  { %v3042_v58 = vpop.permute.xlu1 %991 }
 0x9a9   :  { %2432 = vmatprep.subr.msk.mxu1 %vm119_vm2, %v3042_v58 }
 0x9aa   :  { %2433 = vmatpush3.xpose.msk.msra.mxu1 %vm119_vm2, %v3042_v58 }
 0x9ab   :  { %2608 = vmatprep.subr.bf16.mxu1 %v2731_v3 }
 0x9ad   :  { %2435 = vmatmul.mubr.msk.f32.vlgmr.msra.gmra.mrb[12].mxu1 %vm119_vm2, %v3028_v42 }
 0x9ae   :  { %2610 = vmatpush3.bf16.msra.mxu1 %v2972_v1  ;;  %2452 = vmatprep.mubr.msk.f32.mxu1 %vm2730_vm0, %v2729_v2 }
 0x9af   :  { %2611 = vmatprep.subr.bf16.mxu1 %v2731_v3 }
 0x9b2   :  { %2613 = vmatpush3.bf16.msra.mxu1 %v2984_v7 }
 0xa80   :  { %v2436_v16 = vpop.f32.mrb[12].mxu1 }
 0xa81   :  { %v1077_v61 = vsel %vm806_vm3, %v2436_v16, -1e+30  ;;  %v1067_v62 = vpop.f32.mrb[13].mxu1 }
 0xa82   :  { %v1080_v63 = vsel %vm1078_vm4, %v1077_v61, -inf  ;;  %v1076_v0 = vsel %vm805_vm5, %v1067_v62, -1e+30 }
 0xa83   :  { %v1079_v4 = vsel %vm1078_vm4, %v1076_v0, -inf }
 0xa84   :  { %v1081_v6 = vmax.f32 %v1079_v4, %v1080_v63 }
 0xa86   :  { %v1082_v8 = vrot.slane %v1081_v6, 4 }
 0xa88   :  { %v1083_v9 = vmax.f32 %v1081_v6, %v1082_v8 }
 0xa8a   :  { %v1084_v10 = vrot.slane %v1083_v9, 2 }
 0xa8c   :  { %v1085_v11 = vmax.f32 %v1083_v9, %v1084_v10 }
 0xa8e   :  { %v1086_v12 = vrot.slane %v1085_v11, 1 }
 0xa90   :  { %v1087_v13 = vmax.f32 %v1085_v11, %v1086_v12 }
 0xa92   :  { %v1088_v14 = vsub.f32 %v1067_v62, %v1087_v13  ;;  %v1089_v15 = vsub.f32 %v2436_v16, %v1087_v13 }
 0xa94   :  { %v1090_v18 = vmul.f32 1.442695, %v1088_v14  ;;  %v1092_v30 = vmul.f32 1.442695, %v1089_v15 }
 0xa96   :  { %2671 = vpow2.f32 %v1090_v18 }
 0xa97   :  { %2673 = vpow2.f32 %v1092_v30 }
 0xaa0   :  { %v2672_v19 = vpop.eup %2671 }
 0xaa1   :  { %v2674_v21 = vpop.eup %2673  ;;  %v1094_v22 = vsel %vm805_vm5, %v2672_v19, 0.0 }
 0xaa2   :  { %v1095_v23 = vsel %vm806_vm3, %v2674_v21, 0.0  ;;  %v1096_v24 = vsel %vm1078_vm4, %v1094_v22, 0.0 }
 0xaa3   :  { %v1097_v25 = vsel %vm1078_vm4, %v1095_v23, 0.0 }
 0xaa4   :  { %v1098_v26 = vadd.f32 %v1097_v25, %v1096_v24 }
 0xaa6   :  { %v1099_v27 = vrot.slane %v1098_v26, 4 }
 0xaa8   :  { %v1100_v28 = vadd.f32 %v1099_v27, %v1098_v26 }
 0xaaa   :  { %v1101_v29 = vrot.slane %v1100_v28, 2 }
 0xaac   :  { %v1102_v31 = vadd.f32 %v1101_v29, %v1100_v28 }
 0xaae   :  { %v1103_v32 = vrot.slane %v1102_v31, 1 }
 0xab0   :  { %v1104_v33 = vadd.f32 %v1103_v32, %v1102_v31 }
 0xab2   :  { %2675 = vrcp.f32 %v1104_v33 }
 0xabc   :  { %v2676_v34 = vpop.eup %2675 }
 0xabd   :  { %v1107_v35 = vmul.f32 %v2676_v34, %v1095_v23  ;;  %v1106_v36 = vmul.f32 %v2676_v34, %v1094_v22 }
 0xabf   :  { %v1111_v37 = vsel %vm1078_vm4, %v1107_v35, 0.0  ;;  %v1108_v41 = vsel %vm1078_vm4, %v1106_v36, 0.0 }
 0xac0   :  { %1112 = vadd.xlane.f32.xlu1 %v1111_v37  ;;  %1109 = vadd.xlane.f32.xlu0 %v1108_v41 }
 0xb4d   :  { %v1113_v40 = vpop.xlane.xlu1 %1112  ;;  %v1110_v44 = vpop.xlane.xlu0 %1109 }
 0xb4e   :  { %v1115_v45 = vmul.f32 %v1113_v40, %v3028_v42  ;;  %v1114_v47 = vmul.f32 %v1110_v44, %v3030_v46 }
 0xb50   :  { %v2606_v55 = vpack.c.bf16 %v1115_v45, %v1114_v47 }
 0xb52   :  { %2607 = vmatpush3.bf16.msra.mxu0 %v2606_v55 }
 0xb53   :  { %2614 = vmatprep.subr.bf16.mxu0 %v2731_v3 }
 0xb55   :  { %2442 = vmatmul.mubr.msk.f32.vlgmr.msra.gmra.mrb[16].mxu0 %vm66_vm1, %v3087_v56 }
 0xb56   :  { %2616 = vmatpush3.bf16.msra.mxu0 %v2995_v17  ;;  %2463 = vmatprep.mubr.msk.f32.mxu0 %vm2730_vm0, %v2729_v2 }
 0xb57   :  { %2617 = vmatprep.subr.bf16.mxu0 %v2731_v3 }
 0xb5a   :  { %2619 = vmatpush3.bf16.msra.mxu0 %v3006_v20 }
 0xb5b   :  { %2620 = vmatprep.subr.bf16.mxu0 %v2731_v3 }
 0xb5d   :  { %2464 = vmatmul.mubr.msk.f32.vlgmr.msra.gmra.mrb[18].mxu0 %vm119_vm2, %v3042_v58 }
 0xb5e   :  { %2475 = vmatprep.mubr.msk.f32.mxu0 %vm2730_vm0, %v2729_v2 }
 0xc28   :  { %v1185_v38 = vpop.f32.mrb[16].mxu0 }
 0xc29   :  { %v2443_v39 = vpop.f32.mrb[17].mxu0  ;;  %2453 = vmatmul.mubr.msk.f32.vlgmr.msra.gmra.mrb[14].mxu1 %vm119_vm2, %v1185_v38 }
 0xc2a   :  { %2468 = vmatprep.mubr.msk.f32.mxu1 %vm119_vm2, %v3030_v46 }
 0xc30   :  { %v1328_v48 = vpop.f32.mrb[18].mxu0 }
 0xc31   :  { %v2465_v5 = vpop.f32.mrb[19].mxu0 }
 0xcfc   :  { %v1258_v49 = vpop.f32.mrb[14].mxu1 }
 0xcfd   :  { %v1329_v50 = vadd.f32 %v1328_v48, %v1258_v49  ;;  %v2454_v51 = vpop.f32.mrb[15].mxu1 }
 0xcff   :  { %v1332_v53 = vadd.f32 %v3026_v43, %v1329_v50 }
 0xd01   :  { %2677 = vtanh.f32 %v1332_v53  ;;  %v2204_v57 = vmul.f32 -1.442695, %v1332_v53 }
 0xd03   :  { %2679 = vpow2.f32 %v2204_v57 }
 0xd0b   :  { %v2678_v54 = vpop.eup %2677 }
 0xd0c   :  { %1342 = vrot.lane.b32.xlu0 %v2678_v54, %s2732_s30 }
 0xd0d   :  { %v2680_v58 = vpop.eup %2679 }
 0xd0e   :  { %v1336_v16 = vadd.f32 1.0, %v2680_v58 }
 0xd10   :  { %2681 = vrcp.f32 %v1336_v16 }
 0xd1a   :  { %v2682_v61 = vpop.eup %2681 }
 0xd1b   :  { %v1340_v0 = vmul.f32 %v2682_v61, %v3037_v52 }
 0xd7e   :  { %v1343_v62 = vpop.permute.xlu0 %1342 }
 0xd7f   :  { %v1345_v63 = vmul.f32 %v2682_v61, %v1343_v62 }
 0xd81   :  { %1347 = vrot.lane.b32.xlu1 %v1345_v63, %s2733_s9 }
 0xdf3   :  { %v1348_v4 = vpop.permute.xlu1 %1347 }
 0xdf4   :  { %v3109_v6 = vadd.f32 %v1348_v4, %v1340_v0 }
 0xdf6   :  { %2683 = vtanh.f32 %v3109_v6 }
 0xe00   :  { %v2684_v8 = vpop.eup %2683 }
 0xe01   :  { %1353 = vrot.lane.b32.xlu0 %v2684_v8, %s2732_s30 }
 0xe73   :  { %v1354_v9 = vpop.permute.xlu0 %1353 }
 0xe74   :  { %v1356_v10 = vmul.f32 %v2682_v61, %v1354_v9 }
 0xe76   :  { %1358 = vrot.lane.b32.xlu1 %v1356_v10, %s2733_s9 }
 0xee8   :  { %v1359_v11 = vpop.permute.xlu1 %1358 }
 0xee9   :  { %2466 = vmatprep.subr.msk.mxu1 %vm119_vm2, %v1359_v11 }
 0xeea   :  { %2467 = vmatpush3.xpose.msk.msra.mxu1 %vm119_vm2, %v1359_v11 }
 0xeeb   :  { %2623 = vmatprep.subr.bf16.mxu1 %v2731_v3 }
 0xeed   :  { %2469 = vmatmul.mubr.msk.f32.vlgmr.msra.gmra.mrb[16].mxu1 %vm119_vm2, %v3028_v42 }
 0xeee   :  { %2625 = vmatpush3.bf16.msra.mxu1 %v2972_v1  ;;  %2486 = vmatprep.mubr.msk.f32.mxu1 %vm2730_vm0, %v2729_v2 }
 0xeef   :  { %2626 = vmatprep.subr.bf16.mxu1 %v2731_v3 }
 0xef2   :  { %2628 = vmatpush3.bf16.msra.mxu1 %v2984_v7 }
 0xfc0   :  { %v2470_v52 = vpop.f32.mrb[16].mxu1 }
 0xfc1   :  { %v1438_v12 = vsel %vm806_vm3, %v2470_v52, -1e+30  ;;  %v1428_v13 = vpop.f32.mrb[17].mxu1 }
 0xfc2   :  { %v1440_v14 = vsel %vm1078_vm4, %v1438_v12, -inf  ;;  %v1437_v15 = vsel %vm805_vm5, %v1428_v13, -1e+30 }
 0xfc3   :  { %v1439_v18 = vsel %vm1078_vm4, %v1437_v15, -inf }
 0xfc4   :  { %v1441_v1 = vmax.f32 %v1439_v18, %v1440_v14 }
 0xfc6   :  { %v1442_v30 = vrot.slane %v1441_v1, 4 }
 0xfc8   :  { %v1443_v19 = vmax.f32 %v1441_v1, %v1442_v30 }
 0xfca   :  { %v1444_v21 = vrot.slane %v1443_v19, 2 }
 0xfcc   :  { %v1445_v22 = vmax.f32 %v1443_v19, %v1444_v21 }
 0xfce   :  { %v1446_v23 = vrot.slane %v1445_v22, 1 }
 0xfd0   :  { %v1447_v24 = vmax.f32 %v1445_v22, %v1446_v23 }
 0xfd2   :  { %v1448_v7 = vsub.f32 %v1428_v13, %v1447_v24  ;;  %v1449_v25 = vsub.f32 %v2470_v52, %v1447_v24 }
 0xfd4   :  { %v1450_v26 = vmul.f32 1.442695, %v1448_v7  ;;  %v1452_v27 = vmul.f32 1.442695, %v1449_v25 }
 0xfd6   :  { %2685 = vpow2.f32 %v1450_v26 }
 0xfd7   :  { %2687 = vpow2.f32 %v1452_v27 }
 0xfe0   :  { %v2686_v28 = vpop.eup %2685 }
 0xfe1   :  { %v2688_v29 = vpop.eup %2687  ;;  %v1454_v31 = vsel %vm805_vm5, %v2686_v28, 0.0 }
 0xfe2   :  { %v1455_v32 = vsel %vm806_vm3, %v2688_v29, 0.0  ;;  %v1456_v33 = vsel %vm1078_vm4, %v1454_v31, 0.0 }
 0xfe3   :  { %v1457_v34 = vsel %vm1078_vm4, %v1455_v32, 0.0 }
 0xfe4   :  { %v1458_v35 = vadd.f32 %v1457_v34, %v1456_v33 }
 0xfe6   :  { %v1459_v36 = vrot.slane %v1458_v35, 4 }
 0xfe8   :  { %v1460_v37 = vadd.f32 %v1459_v36, %v1458_v35 }
 0xfea   :  { %v1461_v41 = vrot.slane %v1460_v37, 2 }
 0xfec   :  { %v1462_v40 = vadd.f32 %v1461_v41, %v1460_v37 }
 0xfee   :  { %v1463_v44 = vrot.slane %v1462_v40, 1 }
 0xff0   :  { %v1464_v45 = vadd.f32 %v1463_v44, %v1462_v40 }
 0xff2   :  { %2689 = vrcp.f32 %v1464_v45 }
 0xffc   :  { %v2690_v47 = vpop.eup %2689 }
 0xffd   :  { %v1467_v55 = vmul.f32 %v2690_v47, %v1455_v32  ;;  %v1466_v38 = vmul.f32 %v2690_v47, %v1454_v31 }
 0xfff   :  { %v1471_v39 = vsel %vm1078_vm4, %v1467_v55, 0.0  ;;  %v1468_v48 = vsel %vm1078_vm4, %v1466_v38, 0.0 }
0x1000   :  { %1472 = vadd.xlane.f32.xlu1 %v1471_v39  ;;  %1469 = vadd.xlane.f32.xlu0 %v1468_v48 }
0x108d   :  { %v1473_v5 = vpop.xlane.xlu1 %1472  ;;  %v1470_v49 = vpop.xlane.xlu0 %1469 }
0x108e   :  { %v1475_v50 = vmul.f32 %v1473_v5, %v3028_v42  ;;  %v1474_v51 = vmul.f32 %v1470_v49, %v3030_v46 }
0x1090   :  { %v2621_v53 = vpack.c.bf16 %v1475_v50, %v1474_v51  ;;  %v1907_v51 = vld [vmem:[%s3267_s10 + $0x20] sm:$0xff] }
0x1092   :  { %2622 = vmatpush3.bf16.msra.mxu0 %v2621_v53  ;;  %v1908_v53 = vld [vmem:[%s3267_s10 + $0x28] sm:$0xff] }
0x1093   :  { %2629 = vmatprep.subr.bf16.mxu0 %v2731_v3 }
0x1095   :  { %2476 = vmatmul.mubr.msk.f32.vlgmr.msra.gmra.mrb[20].mxu0 %vm66_vm1, %v3087_v56 }
0x1096   :  { %2631 = vmatpush3.bf16.msra.mxu0 %v2995_v17  ;;  %2497 = vmatprep.mubr.msk.f32.mxu0 %vm2730_vm0, %v2729_v2 }
0x1097   :  { %2632 = vmatprep.subr.bf16.mxu0 %v2731_v3 }
0x109a   :  { %2634 = vmatpush3.bf16.msra.mxu0 %v3006_v20 }
0x109b   :  { %2635 = vmatprep.subr.bf16.mxu0 %v2731_v3 }
0x109d   :  { %2498 = vmatmul.mubr.msk.f32.vlgmr.msra.gmra.mrb[22].mxu0 %vm119_vm2, %v1359_v11 }
0x109e   :  { %2509 = vmatprep.mubr.msk.f32.mxu0 %vm2730_vm0, %v2729_v2 }
0x1168   :  { %v1542_v54 = vpop.f32.mrb[20].mxu0 }
0x1169   :  { %v2477_v57 = vpop.f32.mrb[21].mxu0  ;;  %2487 = vmatmul.mubr.msk.f32.vlgmr.msra.gmra.mrb[18].mxu1 %vm119_vm2, %v1542_v54  ;;  %v1909_v54 = vld [vmem:[%s3267_s10 + $0x30] sm:$0xff] }
0x116a   :  { %2502 = vmatprep.mubr.msk.f32.mxu1 %vm119_vm2, %v3030_v46  ;;  %v2639_v57 = vpack.c.bf16 %v1908_v53, %v1907_v51 }
0x1170   :  { %v1685_v17 = vpop.f32.mrb[22].mxu0 }
0x1171   :  { %v2499_v58 = vpop.f32.mrb[23].mxu0 }
0x123c   :  { %v1615_v16 = vpop.f32.mrb[18].mxu1 }
0x123d   :  { %v1686_v61 = vadd.f32 %v1685_v17, %v1615_v16  ;;  %v2488_v62 = vpop.f32.mrb[19].mxu1  ;;  %v1910_v17 = vld [vmem:[%s3267_s10 + $0x38] sm:$0xff] }
0x123e   :  { %v2642_v58 = vpack.c.bf16 %v1910_v17, %v1909_v54 }
0x123f   :  { %v1689_v20 = vadd.f32 %v3026_v43, %v1686_v61 }
0x1241   :  { %2691 = vtanh.f32 %v1689_v20  ;;  %v2211_v0 = vmul.f32 -1.442695, %v1689_v20 }
0x1243   :  { %2693 = vpow2.f32 %v2211_v0  ;;  %v1904_v0 = vld [vmem:[%s3267_s10 + $0x8] sm:$0xff] }
0x124b   :  { %v2692_v63 = vpop.eup %2691 }
0x124c   :  { %1699 = vrot.lane.b32.xlu0 %v2692_v63, %s2732_s30  ;;  %v1903_v63 = vld [vmem:[%s3267_s10] sm:$0xff] }
0x124d   :  { %v2694_v4 = vpop.eup %2693 }
0x124e   :  { %v1693_v8 = vadd.f32 1.0, %v2694_v4 }
0x1250   :  { %2695 = vrcp.f32 %v1693_v8  ;;  %v2645_v8 = vpack.c.bf16 %v1904_v0, %v1903_v63 }
0x125a   :  { %v2696_v9 = vpop.eup %2695 }
0x125b   :  { %v1697_v52 = vmul.f32 %v2696_v9, %v3109_v6 }
0x12be   :  { %v1700_v10 = vpop.permute.xlu0 %1699 }
0x12bf   :  { %v1702_v11 = vmul.f32 %v2696_v9, %v1700_v10 }
0x12c1   :  { %1704 = vrot.lane.b32.xlu1 %v1702_v11, %s2733_s9 }
0x1333   :  { %v1705_v12 = vpop.permute.xlu1 %1704 }
0x1334   :  { %v1707_v13 = vadd.f32 %v1705_v12, %v1697_v52  ;;  %v2063_v12 = vld [vmem:[%s3269_s12] sm:$0xff] }
0x1336   :  { %2697 = vtanh.f32 %v1707_v13  ;;  %v2064_v13 = vld [vmem:[%s3269_s12 + $0x8] sm:$0xff] }
0x1340   :  { %v2698_v43 = vpop.eup %2697 }
0x1341   :  { %1710 = vrot.lane.b32.xlu0 %v2698_v43, %s2732_s30  ;;  %v2651_v43 = vpack.c.bf16 %v2064_v13, %v2063_v12 }
0x13b3   :  { %v1711_v14 = vpop.permute.xlu0 %1710 }
0x13b4   :  { %v1713_v15 = vmul.f32 %v2696_v9, %v1711_v14  ;;  %v1905_v9 = vld [vmem:[%s3267_s10 + $0x10] sm:$0xff] }
0x13b5   :  { %v2065_v14 = vld [vmem:[%s3269_s12 + $0x10] sm:$0xff] }
0x13b6   :  { %1715 = vrot.lane.b32.xlu1 %v1713_v15, %s2733_s9 }
0x1428   :  { %v3161_v18 = vpop.permute.xlu1 %1715 }
0x1429   :  { %2500 = vmatprep.subr.msk.mxu1 %vm119_vm2, %v3161_v18 }
0x142a   :  { %2501 = vmatpush3.xpose.msk.msra.mxu1 %vm119_vm2, %v3161_v18 }
0x142b   :  { %2638 = vmatprep.subr.bf16.mxu1 %v2731_v3 }
0x142d   :  { %2503 = vmatmul.mubr.msk.f32.vlgmr.msra.gmra.mrb[20].mxu1 %vm119_vm2, %v3028_v42 }
0x142e   :  { %2520 = vmatprep.mubr.msk.f32.mxu1 %vm2730_vm0, %v2729_v2  ;;  %2640 = vmatpush3.bf16.msra.mxu1 %v2639_v57 }
0x142f   :  { %2641 = vmatprep.subr.bf16.mxu1 %v2731_v3 }
0x1432   :  { %2643 = vmatpush3.bf16.msra.mxu1 %v2642_v58 }
0x1433   :  { %2650 = vmatprep.subr.bf16.mxu1 %v2731_v3 }
0x1500   :  { %v2504_v6 = vpop.f32.mrb[20].mxu1 }
0x1501   :  { %v1795_v1 = vsel %vm806_vm3, %v2504_v6, -1e+30  ;;  %v1785_v30 = vpop.f32.mrb[21].mxu1 }
0x1502   :  { %v1797_v19 = vsel %vm1078_vm4, %v1795_v1, -inf  ;;  %v1794_v21 = vsel %vm805_vm5, %v1785_v30, -1e+30 }
0x1503   :  { %v1796_v22 = vsel %vm1078_vm4, %v1794_v21, -inf }
0x1504   :  { %v1798_v23 = vmax.f32 %v1796_v22, %v1797_v19 }
0x1506   :  { %v1799_v24 = vrot.slane %v1798_v23, 4 }
0x1508   :  { %v1800_v7 = vmax.f32 %v1798_v23, %v1799_v24 }
0x150a   :  { %v1801_v25 = vrot.slane %v1800_v7, 2 }
0x150c   :  { %v1802_v26 = vmax.f32 %v1800_v7, %v1801_v25 }
0x150e   :  { %v1803_v27 = vrot.slane %v1802_v26, 1 }
0x1510   :  { %v1804_v28 = vmax.f32 %v1802_v26, %v1803_v27 }
0x1512   :  { %v1805_v29 = vsub.f32 %v1785_v30, %v1804_v28  ;;  %v1806_v31 = vsub.f32 %v2504_v6, %v1804_v28  ;;  %v2218_v6 = vld [vmem:[%s3268_s11] ss:$0 sm:$0xff] }
0x1514   :  { %v1807_v32 = vmul.f32 1.442695, %v1805_v29  ;;  %v1809_v33 = vmul.f32 1.442695, %v1806_v31 }
0x1516   :  { %2699 = vpow2.f32 %v1807_v32 }
0x1517   :  { %2701 = vpow2.f32 %v1809_v33 }
0x1520   :  { %v2700_v34 = vpop.eup %2699 }
0x1521   :  { %v2702_v35 = vpop.eup %2701  ;;  %v1811_v36 = vsel %vm805_vm5, %v2700_v34, 0.0 }
0x1522   :  { %v1812_v37 = vsel %vm806_vm3, %v2702_v35, 0.0  ;;  %v1813_v41 = vsel %vm1078_vm4, %v1811_v36, 0.0 }
0x1523   :  { %v1814_v40 = vsel %vm1078_vm4, %v1812_v37, 0.0 }
0x1524   :  { %v1815_v44 = vadd.f32 %v1814_v40, %v1813_v41 }
0x1526   :  { %v1816_v45 = vrot.slane %v1815_v44, 4 }
0x1528   :  { %v1817_v47 = vadd.f32 %v1816_v45, %v1815_v44 }
0x152a   :  { %v1818_v55 = vrot.slane %v1817_v47, 2 }
0x152c   :  { %v1819_v38 = vadd.f32 %v1818_v55, %v1817_v47 }
0x152e   :  { %v1820_v39 = vrot.slane %v1819_v38, 1 }
0x1530   :  { %v1821_v48 = vadd.f32 %v1820_v39, %v1819_v38 }
0x1532   :  { %2703 = vrcp.f32 %v1821_v48 }
0x153c   :  { %v2704_v5 = vpop.eup %2703 }
0x153d   :  { %v1824_v49 = vmul.f32 %v2704_v5, %v1812_v37  ;;  %v1823_v50 = vmul.f32 %v2704_v5, %v1811_v36 }
0x153f   :  { %v1828_v60 = vsel %vm1078_vm4, %v1824_v49, 0.0  ;;  %v1825_v59 = vsel %vm1078_vm4, %v1823_v50, 0.0 }
0x1540   :  { %1829 = vadd.xlane.f32.xlu1 %v1828_v60  ;;  %1826 = vadd.xlane.f32.xlu0 %v1825_v59 }
0x15cd   :  { %v1830_v16 = vpop.xlane.xlu1 %1829  ;;  %v1827_v61 = vpop.xlane.xlu0 %1826 }
0x15ce   :  { %v1832_v62 = vmul.f32 %v1830_v16, %v3028_v42  ;;  %v1831_v20 = vmul.f32 %v1827_v61, %v3030_v46  ;;  %v1906_v42 = vld [vmem:[%s3267_s10 + $0x18] sm:$0xff] }
0x15cf   :  { %v2648_v46 = vpack.c.bf16 %v1906_v42, %v1905_v9 }
0x15d0   :  { %v2636_v4 = vpack.c.bf16 %v1832_v62, %v1831_v20 }
0x15d2   :  { %2637 = vmatpush3.bf16.msra.mxu0 %v2636_v4 }
0x15d3   :  { %2644 = vmatprep.subr.bf16.mxu0 %v2731_v3 }
0x15d5   :  { %2510 = vmatmul.mubr.msk.f32.vlgmr.msra.gmra.mrb[24].mxu0 %vm66_vm1, %v3087_v56 }
0x15d6   :  { %2646 = vmatpush3.bf16.msra.mxu0 %v2645_v8  ;;  %2531 = vmatprep.mubr.msk.f32.mxu0 %vm2730_vm0, %v2729_v2 }
0x15d7   :  { %2647 = vmatprep.subr.bf16.mxu0 %v2731_v3 }
0x15da   :  { %2649 = vmatpush3.bf16.msra.mxu0 %v2648_v46 }
0x15dd   :  { %2532 = vmatmul.mubr.msk.f32.vlgmr.msra.gmra.mrb[26].mxu0 %vm119_vm2, %v3161_v18 }
0x16a8   :  { %v1899_v10 = vpop.f32.mrb[24].mxu0 }
0x16a9   :  { %v2511_v11 = vpop.f32.mrb[25].mxu0  ;;  %2521 = vmatmul.mubr.msk.f32.vlgmr.msra.gmra.mrb[22].mxu1 %vm119_vm2, %v1899_v10 }
0x16aa   :  { %2542 = vmatprep.mubr.msk.f32.mxu1 %vm2730_vm0, %v2729_v2  ;;  %2652 = vmatpush3.bf16.msra.mxu1 %v2651_v43  ;;  %v2066_v2 = vld [vmem:[%s3269_s12 + $0x18] sm:$0xff]  ;;  %s2705_s12 = scalar_lea.vmem %s2155_s19, 32 }
0x16ab   :  { %2653 = vmatprep.subr.bf16.mxu1 %v2731_v3  ;;  %v2654_v15 = vpack.c.bf16 %v2066_v2, %v2065_v14  ;;  %v2219_v3 = vld [vmem:[%s3270_s13] ss:$0 sm:$0xff]  ;;  %p2706_p0 = scmp.ne.s32.totalorder %s2155_s19, %s2705_s12  ;;  %p2711_p2 = scmp.lt.s32.totalorder %s2705_s12, %s2705_s12 }
0x16ad   :  { %p2712_p3 = por %p2711_p2, %p2710_p1 }
0x16ae   :  { %2655 = vmatpush3.bf16.msra.mxu1 %v2654_v15 }
0x16af   :  { %p2713_p4 = pnand %p2712_p3, %p2706_p0 }
0x16b0   :  { %v2050_v52 = vpop.f32.mrb[26].mxu0 }
0x16b1   :  { %v2533_v56 = vpop.f32.mrb[27].mxu0 }
0x177c   :  { %v1980_v18 = vpop.f32.mrb[22].mxu1 }
0x177d   :  { %v2051_v1 = vadd.f32 %v2050_v52, %v1980_v18  ;;  %v2522_v30 = vpop.f32.mrb[23].mxu1 }
0x177f   :  { %v2061_v19 = vadd.f32 %v2218_v6, %v2051_v1 }
0x1781   :  { %v2062_v21 = vmax.f32 %v2061_v19, 0.0 }
0x1783   :  { %2543 = vmatmul.mubr.msk.f32.vlgmr.msra.gmra.mrb[24].mxu1 %vm119_vm2, %v2062_v21 }
0x1856   :  { %v2143_v22 = vpop.f32.mrb[24].mxu1 }
0x1857   :  { %v2144_v23 = vadd.f32 %v2219_v3, %v2143_v22  ;;  %v2544_v24 = vpop.f32.mrb[25].mxu1 }
0x1859   :  { %2147 = vst [vmem:[#allocation2] sm:$0x3] %v2144_v23 }
0x185a   :  { %2716 = shalt.err (!%p2713_p4)
}
0x185b   :  { %s2717_s5 = scalar_lea.hbm %s3271_s14, 32 }
0x185c   :  { %p2718_p5 = scmp.ne.s32.totalorder %s3271_s14, %s2717_s5  ;;  %p2721_p6 = scmp.lt.u32.totalorder %s2717_s5, %s3271_s14 }
0x185e   :  { %p2723_p7 = pnand %p2721_p6, %p2718_p5 }
0x1860   :  { %2726 = shalt.err (!%p2723_p7)
}
0x1861   :  { %2157 = dma.vmem_to_hbm [thread:$0]  %s2155_s19, 32, %s3271_s14, [#allocation3]  }
0x1862   :  { %2727 = dma.done.wait [#allocation3], 32  }
0x1863   :  { %2728 = vsyncadd [#allocation3], 4294967264 }
0x1864   :  { %2161 = vsyncpa [#allocation3], 1 }

</bundles_post_ra>
